<compile_context>
chip_gen: v5e
topology: v5e:2x2
jax: 0.10.0
libtpu: 0.0.40
codegen_flags: <defaults>
</compile_context>

<pallas_src>
import functools

import numpy as np
import jax
import jax.numpy as jnp
from jax import lax
from jax.experimental import pallas as pl
from jax.experimental.pallas import tpu as pltpu

LN_EPS = 1e-5
_SQRT2 = np.float32(np.sqrt(2.0))


def _gelu_exact(x):
    # PyTorch nn.GELU() default = exact (erf-based) GELU.
    return 0.5 * x * (1.0 + lax.erf(x / _SQRT2))


def _softmax_last(s):
    m = jnp.max(s, axis=-1, keepdims=True)
    e = jnp.exp(s - m)
    # divide -> EUP reciprocal + VPU multiply
    return e * pl.reciprocal(jnp.sum(e, axis=-1, keepdims=True), approx=True)


def _layernorm(x, g, b):
    mu = jnp.mean(x, axis=-1, keepdims=True)
    var = jnp.mean((x - mu) ** 2, axis=-1, keepdims=True)
    return (x - mu) * lax.rsqrt(var + LN_EPS) * g + b


def _fusion_kernel(
    x1_ref, x2_ref,
    w1_ref, b1_ref, w2_ref, b2_ref,
    wo1_ref, bo1_ref, wo2_ref, bo2_ref,
    ln1g_ref, ln1b_ref, ln2g_ref, ln2b_ref,
    fused_ref, gate1_ref, gate2_ref,
    out1_ref, out2_ref, attn12_ref, attn21_ref,
    *, B, S1, S2, F,
):
    bf16 = jnp.bfloat16
    f32 = jnp.float32

    x1 = x1_ref[...]                      # (B*S1, H1) f32 (kept f32 for the residual)
    x2 = x2_ref[...]                      # (B*S2, H2) f32

    # ---- fused projections: one wide (H, 6F) bf16 matmul per input side, f32 accum.
    # segment layout along N: [ q*1/sqrt(F) | k | v | gate1-part | gate2-part | fusion-part ]
    p1 = jnp.dot(x1.astype(bf16), w1_ref[...],
                 preferred_element_type=f32) + b1_ref[...]           # (B*S1, 6F)
    p2 = jnp.dot(x2.astype(bf16), w2_ref[...],
                 preferred_element_type=f32) + b2_ref[...]           # (B*S2, 6F)

    q1 = p1[:, 0 * F:1 * F]               # already scaled by 1/sqrt(F) (folded into W/b)
    k1 = p1[:, 1 * F:2 * F]
    v1 = p1[:, 2 * F:3 * F]
    q2 = p2[:, 0 * F:1 * F]
    k2 = p2[:, 1 * F:2 * F]
    v2 = p2[:, 2 * F:3 * F]

    # ---- gate / fusion branch: concat(x1,x2) @ W == x1 @ W[:, :H1].T + x2 @ W[:, H1:].T
    # (bias already folded into the p2 segments; requires seq_len1 == seq_len2)
    gate1_ref[...] = jax.nn.sigmoid(p1[:, 3 * F:4 * F] + p2[:, 3 * F:4 * F])
    gate2_ref[...] = jax.nn.sigmoid(p1[:, 4 * F:5 * F] + p2[:, 4 * F:5 * F])
    fused_ref[...] = _gelu_exact(p1[:, 5 * F:6 * F] + p2[:, 5 * F:6 * F])

    # hoist broadcast-style params once (reused for every batch)
    wo1 = wo1_ref[...]
    wo2 = wo2_ref[...]
    bo1 = bo1_ref[...]
    bo2 = bo2_ref[...]
    ln1g = ln1g_ref[...]
    ln1b = ln1b_ref[...]
    ln2g = ln2g_ref[...]
    ln2b = ln2b_ref[...]

    contract_last = (((1,), (1,)), ((), ()))   # q @ k^T without materializing k^T

    # ---- bidirectional cross-attention, per batch (B is tiny -> static unroll)
    for b in range(B):
        r1 = slice(b * S1, (b + 1) * S1)
        r2 = slice(b * S2, (b + 1) * S2)
        q1_b = q1[r1].astype(bf16)
        k1_b = k1[r1].astype(bf16)
        v1_b = v1[r1].astype(bf16)
        q2_b = q2[r2].astype(bf16)
        k2_b = k2[r2].astype(bf16)
        v2_b = v2[r2].astype(bf16)

        # direction 1: x1 queries attend over x2 keys/values
        s12 = lax.dot_general(q1_b, k2_b, contract_last,
                              preferred_element_type=f32)            # (S1, S2)
        a12 = _softmax_last(s12)
        attn12_ref[b] = a12
        ctx12 = jnp.dot(a12.astype(bf16), v2_b,
                        preferred_element_type=f32)                  # (S1, F)

        # direction 2: x2 queries attend over x1 keys/values
        s21 = lax.dot_general(q2_b, k1_b, contract_last,
                              preferred_element_type=f32)            # (S2, S1)
        a21 = _softmax_last(s21)
        attn21_ref[b] = a21
        ctx21 = jnp.dot(a21.astype(bf16), v1_b,
                        preferred_element_type=f32)                  # (S2, F)

        # output projections + residual + LayerNorm (hidden_dim == fusion_output_dim,
        # so the residual is the raw f32 input)
        o1 = jnp.dot(ctx12.astype(bf16), wo1, preferred_element_type=f32) + bo1
        o2 = jnp.dot(ctx21.astype(bf16), wo2, preferred_element_type=f32) + bo2
        out1_ref[b] = _layernorm(o1 + x1[r1], ln1g, ln1b)
        out2_ref[b] = _layernorm(o2 + x2[r2], ln2g, ln2b)

    # TODO(synk): optional mask1/mask2 (masked_fill with -10000.0) not wired in; the
    #             default forward path (mask=None) is reproduced exactly.


def enhanced_fusion_forward(x1, x2, params):
    """params: dict of PyTorch-layout tensors (W: (out, in), b: (out,))."""
    x1 = jnp.asarray(x1, jnp.float32)
    x2 = jnp.asarray(x2, jnp.float32)
    B, S1, H1 = x1.shape
    B2, S2, H2 = x2.shape
    assert B == B2
    F = params["query1_w"].shape[0]

    if S1 != S2:
        # torch.cat((x1, x2), dim=-1) in the module itself requires equal seq lengths.
        raise NotImplementedError("gate/fusion branch requires seq_len1 == seq_len2")
    if H1 != F or H2 != F:
        # TODO(synk): hidden_dim != fusion_output_dim residual path (projection through
        #             output{1,2}.weight[:, :hidden_dim]) is not implemented.
        raise NotImplementedError("hidden_dim must equal fusion_output_dim")

    inv_scale = 1.0 / (float(F) ** 0.5)
    f32, bf16 = jnp.float32, jnp.bfloat16

    def W(name):
        return jnp.asarray(params[name], f32)

    def bvec(name):
        return jnp.asarray(params[name], f32)

    g1w, g2w, fw = W("gate1_w"), W("gate2_w"), W("fusion_w")   # (F, H1+H2)

    # fused per-side projection weights: (H, 6F) = [q | k | v | gate1 | gate2 | fusion]
    # attention scale folded into the query segment.
    w1 = jnp.concatenate(
        [W("query1_w").T * inv_scale, W("key1_w").T, W("value1_w").T,
         g1w[:, :H1].T, g2w[:, :H1].T, fw[:, :H1].T], axis=1).astype(bf16)      # (H1, 6F)
    w2 = jnp.concatenate(
        [W("query2_w").T * inv_scale, W("key2_w").T, W("value2_w").T,
         g1w[:, H1:].T, g2w[:, H1:].T, fw[:, H1:].T], axis=1).astype(bf16)      # (H2, 6F)

    zf = jnp.zeros((F,), f32)
    b1 = jnp.concatenate(
        [bvec("query1_b") * inv_scale, bvec("key1_b"), bvec("value1_b"),
         zf, zf, zf]).reshape(1, 6 * F)
    b2 = jnp.concatenate(
        [bvec("query2_b") * inv_scale, bvec("key2_b"), bvec("value2_b"),
         bvec("gate1_b"), bvec("gate2_b"), bvec("fusion_b")]).reshape(1, 6 * F)

    wo1 = W("output1_w").T.astype(bf16)
    wo2 = W("output2_w").T.astype(bf16)
    bo1 = bvec("output1_b").reshape(1, F)
    bo2 = bvec("output2_b").reshape(1, F)
    ln1g = bvec("norm1_g").reshape(1, F)
    ln1b = bvec("norm1_b").reshape(1, F)
    ln2g = bvec("norm2_g").reshape(1, F)
    ln2b = bvec("norm2_b").reshape(1, F)

    # fold batch into the row (sublane) dimension for the projection matmuls
    x1_2d = x1.reshape(B * S1, H1)
    x2_2d = x2.reshape(B * S2, H2)

    args = (x1_2d, x2_2d, w1, b1, w2, b2, wo1, bo1, wo2, bo2,
            ln1g, ln1b, ln2g, ln2b)

    def full_spec(shape):
        nd = len(shape)
        return pl.BlockSpec(shape, lambda i, _nd=nd: (0,) * _nd)

    in_specs = [full_spec(a.shape) for a in args]

    out_shape = (
        jax.ShapeDtypeStruct((B * S1, F), jnp.float32),   # fused  (rows = B*S)
        jax.ShapeDtypeStruct((B * S1, F), jnp.float32),   # gate1
        jax.ShapeDtypeStruct((B * S1, F), jnp.float32),   # gate2
        jax.ShapeDtypeStruct((B, S1, F), jnp.float32),    # out1
        jax.ShapeDtypeStruct((B, S2, F), jnp.float32),    # out2
        jax.ShapeDtypeStruct((B, S1, S2), jnp.float32),   # attn1_2
        jax.ShapeDtypeStruct((B, S2, S1), jnp.float32),   # attn2_1
    )
    out_specs = tuple(full_spec(s.shape) for s in out_shape)

    fn = pl.pallas_call(
        functools.partial(_fusion_kernel, B=B, S1=S1, S2=S2, F=F),
        out_shape=out_shape,
        grid_spec=pltpu.PrefetchScalarGridSpec(
            num_scalar_prefetch=0,
            grid=(1,),                       # single step: B folded into rows
            in_specs=in_specs,
            out_specs=out_specs,
        ),
        compiler_params=pltpu.CompilerParams(
            dimension_semantics=("arbitrary",),
            vmem_limit_bytes=64 * 1024 * 1024,   # explicit budget (fits v7x's 64 MiB)
        ),
    )
    fused2, gate1_2, gate2_2, out1, out2, a12, a21 = fn(*args)
    return {
        "fused": fused2.reshape(B, S1, F),
        "out1": out1,
        "out2": out2,
        "gate1": gate1_2.reshape(B, S1, F),
        "gate2": gate2_2.reshape(B, S1, F),
        "attn1_2": a12,
        "attn2_1": a21,
    }


# ------------------------- reference (plain JAX, f32) -------------------------

def reference_forward(x1, x2, p):
    F = p["query1_w"].shape[0]
    scale = float(F) ** 0.5

    def lin(x, w, b):
        return x @ w.T + b

    def ln(x, g, b):
        mu = jnp.mean(x, axis=-1, keepdims=True)
        var = jnp.mean((x - mu) ** 2, axis=-1, keepdims=True)
        return (x - mu) / jnp.sqrt(var + LN_EPS) * g + b

    q1 = lin(x1, p["query1_w"], p["query1_b"])
    k2 = lin(x2, p["key2_w"], p["key2_b"])
    v2 = lin(x2, p["value2_w"], p["value2_b"])
    a12 = jax.nn.softmax(jnp.einsum("bqd,bkd->bqk", q1, k2) / scale, axis=-1)
    ctx12 = jnp.einsum("bqk,bkd->bqd", a12, v2)

    q2 = lin(x2, p["query2_w"], p["query2_b"])
    k1 = lin(x1, p["key1_w"], p["key1_b"])
    v1 = lin(x1, p["value1_w"], p["value1_b"])
    a21 = jax.nn.softmax(jnp.einsum("bqd,bkd->bqk", q2, k1) / scale, axis=-1)
    ctx21 = jnp.einsum("bqk,bkd->bqd", a21, v1)

    out1 = ln(lin(ctx12, p["output1_w"], p["output1_b"]) + x1, p["norm1_g"], p["norm1_b"])
    out2 = ln(lin(ctx21, p["output2_w"], p["output2_b"]) + x2, p["norm2_g"], p["norm2_b"])

    concat = jnp.concatenate([x1, x2], axis=-1)
    fused = jax.nn.gelu(lin(concat, p["fusion_w"], p["fusion_b"]), approximate=False)
    gate1 = jax.nn.sigmoid(lin(concat, p["gate1_w"], p["gate1_b"]))
    gate2 = jax.nn.sigmoid(lin(concat, p["gate2_w"], p["gate2_b"]))
    return {"fused": fused, "out1": out1, "out2": out2,
            "gate1": gate1, "gate2": gate2, "attn1_2": a12, "attn2_1": a21}


# ------------------------- deterministic init -------------------------

def init_params(key, H1, H2, F):
    def linear_init(k, fan_in, fan_out):
        k1, k2 = jax.random.split(k)
        bound = 1.0 / np.sqrt(fan_in)
        w = jax.random.uniform(k1, (fan_out, fan_in), jnp.float32, -bound, bound)
        b = jax.random.uniform(k2, (fan_out,), jnp.float32, -bound, bound)
        return w, b

    names_fans = [
        ("query1", H1), ("key2", H2), ("value2", H2),
        ("query2", H2), ("key1", H1), ("value1", H1),
        ("output1", F), ("output2", F),
        ("gate1", H1 + H2), ("gate2", H1 + H2), ("fusion", H1 + H2),
    ]
    keys = jax.random.split(key, len(names_fans))
    p = {}
    for (name, fan_in), k in zip(names_fans, keys):
        w, b = linear_init(k, fan_in, F)
        p[f"{name}_w"] = w
        p[f"{name}_b"] = b
    p["norm1_g"] = jnp.ones((F,), jnp.float32)
    p["norm1_b"] = jnp.zeros((F,), jnp.float32)
    p["norm2_g"] = jnp.ones((F,), jnp.float32)
    p["norm2_b"] = jnp.zeros((F,), jnp.float32)
    return p


if __name__ == "__main__":
    B, S, H1, H2, F = 2, 8, 32, 32, 32   # hidden dims == fusion dim (residual path)
    key = jax.random.PRNGKey(0)
    kx1, kx2, kp = jax.random.split(key, 3)
    x1 = jax.random.normal(kx1, (B, S, H1), jnp.float32)
    x2 = jax.random.normal(kx2, (B, S, H2), jnp.float32)
    params = init_params(kp, H1, H2, F)

    out = enhanced_fusion_forward(x1, x2, params)
    jax.block_until_ready(out)

    ref = reference_forward(x1, x2, params)
    # Tolerance accounts for bf16 MXU operands + approximate softmax reciprocal in the
    # kernel vs. the pure-f32 reference; structure/semantics are identical.
    for name in ("fused", "out1", "out2", "gate1", "gate2", "attn1_2", "attn2_1"):
        np.testing.assert_allclose(np.asarray(out[name]), np.asarray(ref[name]),
                                   rtol=2e-2, atol=2e-2)

    print("KERNEL_OK")
</pallas_src>

<mosaic_0001>
module attributes {stable_mosaic.version = 11 : i64} {
  func.func @_fusion_kernel(%arg0: i32, %arg1: memref<16x32xf32, #tpu.memory_space<vmem>>, %arg2: memref<16x32xf32, #tpu.memory_space<vmem>>, %arg3: memref<32x192xbf16, #tpu.memory_space<vmem>>, %arg4: memref<1x192xf32, #tpu.memory_space<vmem>>, %arg5: memref<32x192xbf16, #tpu.memory_space<vmem>>, %arg6: memref<1x192xf32, #tpu.memory_space<vmem>>, %arg7: memref<32x32xbf16, #tpu.memory_space<vmem>>, %arg8: memref<1x32xf32, #tpu.memory_space<vmem>>, %arg9: memref<32x32xbf16, #tpu.memory_space<vmem>>, %arg10: memref<1x32xf32, #tpu.memory_space<vmem>>, %arg11: memref<1x32xf32, #tpu.memory_space<vmem>>, %arg12: memref<1x32xf32, #tpu.memory_space<vmem>>, %arg13: memref<1x32xf32, #tpu.memory_space<vmem>>, %arg14: memref<1x32xf32, #tpu.memory_space<vmem>>, %arg15: memref<16x32xf32, #tpu.memory_space<vmem>>, %arg16: memref<16x32xf32, #tpu.memory_space<vmem>>, %arg17: memref<16x32xf32, #tpu.memory_space<vmem>>, %arg18: memref<2x8x32xf32, #tpu.memory_space<vmem>>, %arg19: memref<2x8x32xf32, #tpu.memory_space<vmem>>, %arg20: memref<2x8x8xf32, #tpu.memory_space<vmem>>, %arg21: memref<2x8x8xf32, #tpu.memory_space<vmem>>) attributes {dimension_semantics = [#tpu.dimension_semantics<arbitrary>], iteration_bounds = array<i64: 1>, scalar_prefetch = 0 : i64, scratch_operands = 0 : i64, tpu.core_type = #tpu.core_type<tc>, window_params = [{pipeline_mode = #tpu.pipeline_mode<synchronous>, transform_indices = @transform_0, window_bounds = array<i64: 16, 32>}, {pipeline_mode = #tpu.pipeline_mode<synchronous>, transform_indices = @transform_1, window_bounds = array<i64: 16, 32>}, {pipeline_mode = #tpu.pipeline_mode<synchronous>, transform_indices = @transform_2, window_bounds = array<i64: 32, 192>}, {pipeline_mode = #tpu.pipeline_mode<synchronous>, transform_indices = @transform_3, window_bounds = array<i64: 1, 192>}, {pipeline_mode = #tpu.pipeline_mode<synchronous>, transform_indices = @transform_4, window_bounds = array<i64: 32, 192>}, {pipeline_mode = #tpu.pipeline_mode<synchronous>, transform_indices = @transform_5, window_bounds = array<i64: 1, 192>}, {pipeline_mode = #tpu.pipeline_mode<synchronous>, transform_indices = @transform_6, window_bounds = array<i64: 32, 32>}, {pipeline_mode = #tpu.pipeline_mode<synchronous>, transform_indices = @transform_7, window_bounds = array<i64: 1, 32>}, {pipeline_mode = #tpu.pipeline_mode<synchronous>, transform_indices = @transform_8, window_bounds = array<i64: 32, 32>}, {pipeline_mode = #tpu.pipeline_mode<synchronous>, transform_indices = @transform_9, window_bounds = array<i64: 1, 32>}, {pipeline_mode = #tpu.pipeline_mode<synchronous>, transform_indices = @transform_10, window_bounds = array<i64: 1, 32>}, {pipeline_mode = #tpu.pipeline_mode<synchronous>, transform_indices = @transform_11, window_bounds = array<i64: 1, 32>}, {pipeline_mode = #tpu.pipeline_mode<synchronous>, transform_indices = @transform_12, window_bounds = array<i64: 1, 32>}, {pipeline_mode = #tpu.pipeline_mode<synchronous>, transform_indices = @transform_13, window_bounds = array<i64: 1, 32>}, {pipeline_mode = #tpu.pipeline_mode<synchronous>, transform_indices = @transform_14, window_bounds = array<i64: 16, 32>}, {pipeline_mode = #tpu.pipeline_mode<synchronous>, transform_indices = @transform_15, window_bounds = array<i64: 16, 32>}, {pipeline_mode = #tpu.pipeline_mode<synchronous>, transform_indices = @transform_16, window_bounds = array<i64: 16, 32>}, {pipeline_mode = #tpu.pipeline_mode<synchronous>, transform_indices = @transform_17, window_bounds = array<i64: 2, 8, 32>}, {pipeline_mode = #tpu.pipeline_mode<synchronous>, transform_indices = @transform_18, window_bounds = array<i64: 2, 8, 32>}, {pipeline_mode = #tpu.pipeline_mode<synchronous>, transform_indices = @transform_19, window_bounds = array<i64: 2, 8, 8>}, {pipeline_mode = #tpu.pipeline_mode<synchronous>, transform_indices = @transform_20, window_bounds = array<i64: 2, 8, 8>}]} {
    %c0 = arith.constant 0 : index
    %c0_0 = arith.constant 0 : index
    %0 = vector.load %arg1[%c0, %c0_0] : memref<16x32xf32, #tpu.memory_space<vmem>>, vector<16x32xf32>
    %c0_1 = arith.constant 0 : index
    %c0_2 = arith.constant 0 : index
    %1 = vector.load %arg2[%c0_1, %c0_2] : memref<16x32xf32, #tpu.memory_space<vmem>>, vector<16x32xf32>
    %2 = arith.truncf %0 : vector<16x32xf32> to vector<16x32xbf16>
    %c0_3 = arith.constant 0 : index
    %c0_4 = arith.constant 0 : index
    %3 = vector.load %arg3[%c0_3, %c0_4] : memref<32x192xbf16, #tpu.memory_space<vmem>>, vector<32x192xbf16>
    %cst = arith.constant dense<0.000000e+00> : vector<16x192xf32>
    %4 = tpu.matmul %2, %3, %cst {dimension_numbers = #tpu.dot_dimension_numbers<[1], [0], [0], [1], [0, 0, 1, 1], [], []>} : vector<16x32xbf16>, vector<32x192xbf16>, vector<16x192xf32> -> vector<16x192xf32>
    %c0_5 = arith.constant 0 : index
    %c0_6 = arith.constant 0 : index
    %5 = vector.load %arg4[%c0_5, %c0_6] : memref<1x192xf32, #tpu.memory_space<vmem>>, vector<1x192xf32>
    %6 = vector.broadcast %5 : vector<1x192xf32> to vector<16x192xf32>
    %7 = arith.addf %4, %6 : vector<16x192xf32>
    %8 = arith.truncf %1 : vector<16x32xf32> to vector<16x32xbf16>
    %c0_7 = arith.constant 0 : index
    %c0_8 = arith.constant 0 : index
    %9 = vector.load %arg5[%c0_7, %c0_8] : memref<32x192xbf16, #tpu.memory_space<vmem>>, vector<32x192xbf16>
    %cst_9 = arith.constant dense<0.000000e+00> : vector<16x192xf32>
    %10 = tpu.matmul %8, %9, %cst_9 {dimension_numbers = #tpu.dot_dimension_numbers<[1], [0], [0], [1], [0, 0, 1, 1], [], []>} : vector<16x32xbf16>, vector<32x192xbf16>, vector<16x192xf32> -> vector<16x192xf32>
    %c0_10 = arith.constant 0 : index
    %c0_11 = arith.constant 0 : index
    %11 = vector.load %arg6[%c0_10, %c0_11] : memref<1x192xf32, #tpu.memory_space<vmem>>, vector<1x192xf32>
    %12 = vector.broadcast %11 : vector<1x192xf32> to vector<16x192xf32>
    %13 = arith.addf %10, %12 : vector<16x192xf32>
    %14 = vector.extract_strided_slice %7 {offsets = [0, 0], sizes = [16, 32], strides = [1, 1]} : vector<16x192xf32> to vector<16x32xf32>
    %15 = vector.extract_strided_slice %7 {offsets = [0, 32], sizes = [16, 32], strides = [1, 1]} : vector<16x192xf32> to vector<16x32xf32>
    %16 = vector.extract_strided_slice %7 {offsets = [0, 64], sizes = [16, 32], strides = [1, 1]} : vector<16x192xf32> to vector<16x32xf32>
    %17 = vector.extract_strided_slice %13 {offsets = [0, 0], sizes = [16, 32], strides = [1, 1]} : vector<16x192xf32> to vector<16x32xf32>
    %18 = vector.extract_strided_slice %13 {offsets = [0, 32], sizes = [16, 32], strides = [1, 1]} : vector<16x192xf32> to vector<16x32xf32>
    %19 = vector.extract_strided_slice %13 {offsets = [0, 64], sizes = [16, 32], strides = [1, 1]} : vector<16x192xf32> to vector<16x32xf32>
    %20 = vector.extract_strided_slice %7 {offsets = [0, 96], sizes = [16, 32], strides = [1, 1]} : vector<16x192xf32> to vector<16x32xf32>
    %21 = vector.extract_strided_slice %13 {offsets = [0, 96], sizes = [16, 32], strides = [1, 1]} : vector<16x192xf32> to vector<16x32xf32>
    %22 = arith.addf %20, %21 : vector<16x32xf32>
    %23 = arith.negf %22 : vector<16x32xf32>
    %24 = math.exp %23 : vector<16x32xf32>
    %cst_12 = arith.constant 1.000000e+00 : f32
    %25 = vector.broadcast %cst_12 : f32 to vector<16x32xf32>
    %26 = arith.addf %25, %24 : vector<16x32xf32>
    %27 = arith.divf %25, %26 : vector<16x32xf32>
    %c0_13 = arith.constant 0 : index
    %c0_14 = arith.constant 0 : index
    %28 = vector.load %arg16[%c0_13, %c0_14] : memref<16x32xf32, #tpu.memory_space<vmem>>, vector<16x32xf32>
    tpu.vector_store %arg16[%c0_13, %c0_14], %27 {strides = array<i32>} : memref<16x32xf32, #tpu.memory_space<vmem>>, vector<16x32xf32>,
    %29 = vector.extract_strided_slice %7 {offsets = [0, 128], sizes = [16, 32], strides = [1, 1]} : vector<16x192xf32> to vector<16x32xf32>
    %30 = vector.extract_strided_slice %13 {offsets = [0, 128], sizes = [16, 32], strides = [1, 1]} : vector<16x192xf32> to vector<16x32xf32>
    %31 = arith.addf %29, %30 : vector<16x32xf32>
    %32 = arith.negf %31 : vector<16x32xf32>
    %33 = math.exp %32 : vector<16x32xf32>
    %cst_15 = arith.constant 1.000000e+00 : f32
    %34 = vector.broadcast %cst_15 : f32 to vector<16x32xf32>
    %35 = arith.addf %34, %33 : vector<16x32xf32>
    %36 = arith.divf %34, %35 : vector<16x32xf32>
    %c0_16 = arith.constant 0 : index
    %c0_17 = arith.constant 0 : index
    %37 = vector.load %arg17[%c0_16, %c0_17] : memref<16x32xf32, #tpu.memory_space<vmem>>, vector<16x32xf32>
    tpu.vector_store %arg17[%c0_16, %c0_17], %36 {strides = array<i32>} : memref<16x32xf32, #tpu.memory_space<vmem>>, vector<16x32xf32>,
    %38 = vector.extract_strided_slice %7 {offsets = [0, 160], sizes = [16, 32], strides = [1, 1]} : vector<16x192xf32> to vector<16x32xf32>
    %39 = vector.extract_strided_slice %13 {offsets = [0, 160], sizes = [16, 32], strides = [1, 1]} : vector<16x192xf32> to vector<16x32xf32>
    %40 = arith.addf %38, %39 : vector<16x32xf32>
    %cst_18 = arith.constant 5.000000e-01 : f32
    %41 = vector.broadcast %cst_18 : f32 to vector<16x32xf32>
    %42 = arith.mulf %41, %40 : vector<16x32xf32>
    %cst_19 = arith.constant 1.41421354 : f32
    %43 = vector.broadcast %cst_19 : f32 to vector<16x32xf32>
    %44 = arith.divf %40, %43 : vector<16x32xf32>
    %45 = math.erf %44 : vector<16x32xf32>
    %cst_20 = arith.constant 1.000000e+00 : f32
    %46 = vector.broadcast %cst_20 : f32 to vector<16x32xf32>
    %47 = arith.addf %46, %45 : vector<16x32xf32>
    %48 = arith.mulf %42, %47 : vector<16x32xf32>
    %c0_21 = arith.constant 0 : index
    %c0_22 = arith.constant 0 : index
    %49 = vector.load %arg15[%c0_21, %c0_22] : memref<16x32xf32, #tpu.memory_space<vmem>>, vector<16x32xf32>
    tpu.vector_store %arg15[%c0_21, %c0_22], %48 {strides = array<i32>} : memref<16x32xf32, #tpu.memory_space<vmem>>, vector<16x32xf32>,
    %c0_23 = arith.constant 0 : index
    %c0_24 = arith.constant 0 : index
    %50 = vector.load %arg7[%c0_23, %c0_24] : memref<32x32xbf16, #tpu.memory_space<vmem>>, vector<32x32xbf16>
    %c0_25 = arith.constant 0 : index
    %c0_26 = arith.constant 0 : index
    %51 = vector.load %arg9[%c0_25, %c0_26] : memref<32x32xbf16, #tpu.memory_space<vmem>>, vector<32x32xbf16>
    %c0_27 = arith.constant 0 : index
    %c0_28 = arith.constant 0 : index
    %52 = vector.load %arg8[%c0_27, %c0_28] : memref<1x32xf32, #tpu.memory_space<vmem>>, vector<1x32xf32>
    %c0_29 = arith.constant 0 : index
    %c0_30 = arith.constant 0 : index
    %53 = vector.load %arg10[%c0_29, %c0_30] : memref<1x32xf32, #tpu.memory_space<vmem>>, vector<1x32xf32>
    %c0_31 = arith.constant 0 : index
    %c0_32 = arith.constant 0 : index
    %54 = vector.load %arg11[%c0_31, %c0_32] : memref<1x32xf32, #tpu.memory_space<vmem>>, vector<1x32xf32>
    %c0_33 = arith.constant 0 : index
    %c0_34 = arith.constant 0 : index
    %55 = vector.load %arg12[%c0_33, %c0_34] : memref<1x32xf32, #tpu.memory_space<vmem>>, vector<1x32xf32>
    %c0_35 = arith.constant 0 : index
    %c0_36 = arith.constant 0 : index
    %56 = vector.load %arg13[%c0_35, %c0_36] : memref<1x32xf32, #tpu.memory_space<vmem>>, vector<1x32xf32>
    %c0_37 = arith.constant 0 : index
    %c0_38 = arith.constant 0 : index
    %57 = vector.load %arg14[%c0_37, %c0_38] : memref<1x32xf32, #tpu.memory_space<vmem>>, vector<1x32xf32>
    %58 = vector.extract_strided_slice %14 {offsets = [0, 0], sizes = [8, 32], strides = [1, 1]} : vector<16x32xf32> to vector<8x32xf32>
    %59 = arith.truncf %58 : vector<8x32xf32> to vector<8x32xbf16>
    %60 = vector.extract_strided_slice %15 {offsets = [0, 0], sizes = [8, 32], strides = [1, 1]} : vector<16x32xf32> to vector<8x32xf32>
    %61 = arith.truncf %60 : vector<8x32xf32> to vector<8x32xbf16>
    %62 = vector.extract_strided_slice %16 {offsets = [0, 0], sizes = [8, 32], strides = [1, 1]} : vector<16x32xf32> to vector<8x32xf32>
    %63 = arith.truncf %62 : vector<8x32xf32> to vector<8x32xbf16>
    %64 = vector.extract_strided_slice %17 {offsets = [0, 0], sizes = [8, 32], strides = [1, 1]} : vector<16x32xf32> to vector<8x32xf32>
    %65 = arith.truncf %64 : vector<8x32xf32> to vector<8x32xbf16>
    %66 = vector.extract_strided_slice %18 {offsets = [0, 0], sizes = [8, 32], strides = [1, 1]} : vector<16x32xf32> to vector<8x32xf32>
    %67 = arith.truncf %66 : vector<8x32xf32> to vector<8x32xbf16>
    %68 = vector.extract_strided_slice %19 {offsets = [0, 0], sizes = [8, 32], strides = [1, 1]} : vector<16x32xf32> to vector<8x32xf32>
    %69 = arith.truncf %68 : vector<8x32xf32> to vector<8x32xbf16>
    %cst_39 = arith.constant dense<0.000000e+00> : vector<8x8xf32>
    %70 = tpu.matmul %59, %67, %cst_39 {dimension_numbers = #tpu.dot_dimension_numbers<[1], [1], [0], [0], [0, 0, 1, 0], [], []>} : vector<8x32xbf16>, vector<8x32xbf16>, vector<8x8xf32> -> vector<8x8xf32>
    %cst_40 = arith.constant dense<0xFF800000> : vector<8xf32>
    %71 = vector.multi_reduction <maximumf>, %70, %cst_40 [1] : vector<8x8xf32> to vector<8xf32>
    %72 = vector.shape_cast %71 : vector<8xf32> to vector<8x1xf32>
    %73 = vector.broadcast %72 : vector<8x1xf32> to vector<8x8xf32>
    %74 = arith.subf %70, %73 : vector<8x8xf32>
    %75 = math.exp %74 : vector<8x8xf32>
    %cst_41 = arith.constant dense<0.000000e+00> : vector<8xf32>
    %76 = vector.multi_reduction <add>, %75, %cst_41 [1] : vector<8x8xf32> to vector<8xf32>
    %77 = vector.shape_cast %76 : vector<8xf32> to vector<8x1xf32>
    %78 = tpu.reciprocal %77 {approx = true} : vector<8x1xf32> -> vector<8x1xf32>
    %79 = vector.broadcast %78 : vector<8x1xf32> to vector<8x8xf32>
    %80 = arith.mulf %75, %79 : vector<8x8xf32>
    %c0_42 = arith.constant 0 : index
    %c0_43 = arith.constant 0 : index
    %c0_44 = arith.constant 0 : index
    %81 = vector.load %arg20[%c0_42, %c0_43, %c0_44] : memref<2x8x8xf32, #tpu.memory_space<vmem>>, vector<1x8x8xf32>
    %82 = vector.shape_cast %81 : vector<1x8x8xf32> to vector<8x8xf32>
    %83 = vector.shape_cast %80 : vector<8x8xf32> to vector<1x8x8xf32>
    tpu.vector_store %arg20[%c0_42, %c0_43, %c0_44], %83 {strides = array<i32>} : memref<2x8x8xf32, #tpu.memory_space<vmem>>, vector<1x8x8xf32>,
    %84 = arith.truncf %80 : vector<8x8xf32> to vector<8x8xbf16>
    %cst_45 = arith.constant dense<0.000000e+00> : vector<8x32xf32>
    %85 = tpu.matmul %84, %69, %cst_45 {dimension_numbers = #tpu.dot_dimension_numbers<[1], [0], [0], [1], [0, 0, 1, 1], [], []>} : vector<8x8xbf16>, vector<8x32xbf16>, vector<8x32xf32> -> vector<8x32xf32>
    %cst_46 = arith.constant dense<0.000000e+00> : vector<8x8xf32>
    %86 = tpu.matmul %65, %61, %cst_46 {dimension_numbers = #tpu.dot_dimension_numbers<[1], [1], [0], [0], [0, 0, 1, 0], [], []>} : vector<8x32xbf16>, vector<8x32xbf16>, vector<8x8xf32> -> vector<8x8xf32>
    %cst_47 = arith.constant dense<0xFF800000> : vector<8xf32>
    %87 = vector.multi_reduction <maximumf>, %86, %cst_47 [1] : vector<8x8xf32> to vector<8xf32>
    %88 = vector.shape_cast %87 : vector<8xf32> to vector<8x1xf32>
    %89 = vector.broadcast %88 : vector<8x1xf32> to vector<8x8xf32>
    %90 = arith.subf %86, %89 : vector<8x8xf32>
    %91 = math.exp %90 : vector<8x8xf32>
    %cst_48 = arith.constant dense<0.000000e+00> : vector<8xf32>
    %92 = vector.multi_reduction <add>, %91, %cst_48 [1] : vector<8x8xf32> to vector<8xf32>
    %93 = vector.shape_cast %92 : vector<8xf32> to vector<8x1xf32>
    %94 = tpu.reciprocal %93 {approx = true} : vector<8x1xf32> -> vector<8x1xf32>
    %95 = vector.broadcast %94 : vector<8x1xf32> to vector<8x8xf32>
    %96 = arith.mulf %91, %95 : vector<8x8xf32>
    %c0_49 = arith.constant 0 : index
    %c0_50 = arith.constant 0 : index
    %c0_51 = arith.constant 0 : index
    %97 = vector.load %arg21[%c0_49, %c0_50, %c0_51] : memref<2x8x8xf32, #tpu.memory_space<vmem>>, vector<1x8x8xf32>
    %98 = vector.shape_cast %97 : vector<1x8x8xf32> to vector<8x8xf32>
    %99 = vector.shape_cast %96 : vector<8x8xf32> to vector<1x8x8xf32>
    tpu.vector_store %arg21[%c0_49, %c0_50, %c0_51], %99 {strides = array<i32>} : memref<2x8x8xf32, #tpu.memory_space<vmem>>, vector<1x8x8xf32>,
    %100 = arith.truncf %96 : vector<8x8xf32> to vector<8x8xbf16>
    %cst_52 = arith.constant dense<0.000000e+00> : vector<8x32xf32>
    %101 = tpu.matmul %100, %63, %cst_52 {dimension_numbers = #tpu.dot_dimension_numbers<[1], [0], [0], [1], [0, 0, 1, 1], [], []>} : vector<8x8xbf16>, vector<8x32xbf16>, vector<8x32xf32> -> vector<8x32xf32>
    %102 = arith.truncf %85 : vector<8x32xf32> to vector<8x32xbf16>
    %cst_53 = arith.constant dense<0.000000e+00> : vector<8x32xf32>
    %103 = tpu.matmul %102, %50, %cst_53 {dimension_numbers = #tpu.dot_dimension_numbers<[1], [0], [0], [1], [0, 0, 1, 1], [], []>} : vector<8x32xbf16>, vector<32x32xbf16>, vector<8x32xf32> -> vector<8x32xf32>
    %104 = vector.broadcast %52 : vector<1x32xf32> to vector<8x32xf32>
    %105 = arith.addf %103, %104 : vector<8x32xf32>
    %106 = arith.truncf %101 : vector<8x32xf32> to vector<8x32xbf16>
    %cst_54 = arith.constant dense<0.000000e+00> : vector<8x32xf32>
    %107 = tpu.matmul %106, %51, %cst_54 {dimension_numbers = #tpu.dot_dimension_numbers<[1], [0], [0], [1], [0, 0, 1, 1], [], []>} : vector<8x32xbf16>, vector<32x32xbf16>, vector<8x32xf32> -> vector<8x32xf32>
    %108 = vector.broadcast %53 : vector<1x32xf32> to vector<8x32xf32>
    %109 = arith.addf %107, %108 : vector<8x32xf32>
    %110 = vector.extract_strided_slice %0 {offsets = [0, 0], sizes = [8, 32], strides = [1, 1]} : vector<16x32xf32> to vector<8x32xf32>
    %111 = arith.addf %105, %110 : vector<8x32xf32>
    %cst_55 = arith.constant dense<0.000000e+00> : vector<8xf32>
    %112 = vector.multi_reduction <add>, %111, %cst_55 [1] : vector<8x32xf32> to vector<8xf32>
    %113 = vector.shape_cast %112 : vector<8xf32> to vector<8x1xf32>
    %cst_56 = arith.constant 3.200000e+01 : f32
    %114 = vector.broadcast %cst_56 : f32 to vector<8x1xf32>
    %115 = arith.divf %113, %114 : vector<8x1xf32>
    %116 = vector.broadcast %115 : vector<8x1xf32> to vector<8x32xf32>
    %117 = arith.subf %111, %116 : vector<8x32xf32>
    %118 = arith.mulf %117, %117 : vector<8x32xf32>
    %cst_57 = arith.constant dense<0.000000e+00> : vector<8xf32>
    %119 = vector.multi_reduction <add>, %118, %cst_57 [1] : vector<8x32xf32> to vector<8xf32>
    %120 = vector.shape_cast %119 : vector<8xf32> to vector<8x1xf32>
    %cst_58 = arith.constant 3.200000e+01 : f32
    %121 = vector.broadcast %cst_58 : f32 to vector<8x1xf32>
    %122 = arith.divf %120, %121 : vector<8x1xf32>
    %123 = vector.broadcast %115 : vector<8x1xf32> to vector<8x32xf32>
    %124 = arith.subf %111, %123 : vector<8x32xf32>
    %cst_59 = arith.constant 9.99999974E-6 : f32
    %125 = vector.broadcast %cst_59 : f32 to vector<8x1xf32>
    %126 = arith.addf %122, %125 : vector<8x1xf32>
    %127 = math.rsqrt %126 : vector<8x1xf32>
    %128 = vector.broadcast %127 : vector<8x1xf32> to vector<8x32xf32>
    %129 = arith.mulf %124, %128 : vector<8x32xf32>
    %130 = vector.broadcast %54 : vector<1x32xf32> to vector<8x32xf32>
    %131 = arith.mulf %129, %130 : vector<8x32xf32>
    %132 = vector.broadcast %55 : vector<1x32xf32> to vector<8x32xf32>
    %133 = arith.addf %131, %132 : vector<8x32xf32>
    %c0_60 = arith.constant 0 : index
    %c0_61 = arith.constant 0 : index
    %c0_62 = arith.constant 0 : index
    %134 = vector.load %arg18[%c0_60, %c0_61, %c0_62] : memref<2x8x32xf32, #tpu.memory_space<vmem>>, vector<1x8x32xf32>
    %135 = vector.shape_cast %134 : vector<1x8x32xf32> to vector<8x32xf32>
    %136 = vector.shape_cast %133 : vector<8x32xf32> to vector<1x8x32xf32>
    tpu.vector_store %arg18[%c0_60, %c0_61, %c0_62], %136 {strides = array<i32>} : memref<2x8x32xf32, #tpu.memory_space<vmem>>, vector<1x8x32xf32>,
    %137 = vector.extract_strided_slice %1 {offsets = [0, 0], sizes = [8, 32], strides = [1, 1]} : vector<16x32xf32> to vector<8x32xf32>
    %138 = arith.addf %109, %137 : vector<8x32xf32>
    %cst_63 = arith.constant dense<0.000000e+00> : vector<8xf32>
    %139 = vector.multi_reduction <add>, %138, %cst_63 [1] : vector<8x32xf32> to vector<8xf32>
    %140 = vector.shape_cast %139 : vector<8xf32> to vector<8x1xf32>
    %cst_64 = arith.constant 3.200000e+01 : f32
    %141 = vector.broadcast %cst_64 : f32 to vector<8x1xf32>
    %142 = arith.divf %140, %141 : vector<8x1xf32>
    %143 = vector.broadcast %142 : vector<8x1xf32> to vector<8x32xf32>
    %144 = arith.subf %138, %143 : vector<8x32xf32>
    %145 = arith.mulf %144, %144 : vector<8x32xf32>
    %cst_65 = arith.constant dense<0.000000e+00> : vector<8xf32>
    %146 = vector.multi_reduction <add>, %145, %cst_65 [1] : vector<8x32xf32> to vector<8xf32>
    %147 = vector.shape_cast %146 : vector<8xf32> to vector<8x1xf32>
    %cst_66 = arith.constant 3.200000e+01 : f32
    %148 = vector.broadcast %cst_66 : f32 to vector<8x1xf32>
    %149 = arith.divf %147, %148 : vector<8x1xf32>
    %150 = vector.broadcast %142 : vector<8x1xf32> to vector<8x32xf32>
    %151 = arith.subf %138, %150 : vector<8x32xf32>
    %cst_67 = arith.constant 9.99999974E-6 : f32
    %152 = vector.broadcast %cst_67 : f32 to vector<8x1xf32>
    %153 = arith.addf %149, %152 : vector<8x1xf32>
    %154 = math.rsqrt %153 : vector<8x1xf32>
    %155 = vector.broadcast %154 : vector<8x1xf32> to vector<8x32xf32>
    %156 = arith.mulf %151, %155 : vector<8x32xf32>
    %157 = vector.broadcast %56 : vector<1x32xf32> to vector<8x32xf32>
    %158 = arith.mulf %156, %157 : vector<8x32xf32>
    %159 = vector.broadcast %57 : vector<1x32xf32> to vector<8x32xf32>
    %160 = arith.addf %158, %159 : vector<8x32xf32>
    %c0_68 = arith.constant 0 : index
    %c0_69 = arith.constant 0 : index
    %c0_70 = arith.constant 0 : index
    %161 = vector.load %arg19[%c0_68, %c0_69, %c0_70] : memref<2x8x32xf32, #tpu.memory_space<vmem>>, vector<1x8x32xf32>
    %162 = vector.shape_cast %161 : vector<1x8x32xf32> to vector<8x32xf32>
    %163 = vector.shape_cast %160 : vector<8x32xf32> to vector<1x8x32xf32>
    tpu.vector_store %arg19[%c0_68, %c0_69, %c0_70], %163 {strides = array<i32>} : memref<2x8x32xf32, #tpu.memory_space<vmem>>, vector<1x8x32xf32>,
    %164 = vector.extract_strided_slice %14 {offsets = [8, 0], sizes = [8, 32], strides = [1, 1]} : vector<16x32xf32> to vector<8x32xf32>
    %165 = arith.truncf %164 : vector<8x32xf32> to vector<8x32xbf16>
    %166 = vector.extract_strided_slice %15 {offsets = [8, 0], sizes = [8, 32], strides = [1, 1]} : vector<16x32xf32> to vector<8x32xf32>
    %167 = arith.truncf %166 : vector<8x32xf32> to vector<8x32xbf16>
    %168 = vector.extract_strided_slice %16 {offsets = [8, 0], sizes = [8, 32], strides = [1, 1]} : vector<16x32xf32> to vector<8x32xf32>
    %169 = arith.truncf %168 : vector<8x32xf32> to vector<8x32xbf16>
    %170 = vector.extract_strided_slice %17 {offsets = [8, 0], sizes = [8, 32], strides = [1, 1]} : vector<16x32xf32> to vector<8x32xf32>
    %171 = arith.truncf %170 : vector<8x32xf32> to vector<8x32xbf16>
    %172 = vector.extract_strided_slice %18 {offsets = [8, 0], sizes = [8, 32], strides = [1, 1]} : vector<16x32xf32> to vector<8x32xf32>
    %173 = arith.truncf %172 : vector<8x32xf32> to vector<8x32xbf16>
    %174 = vector.extract_strided_slice %19 {offsets = [8, 0], sizes = [8, 32], strides = [1, 1]} : vector<16x32xf32> to vector<8x32xf32>
    %175 = arith.truncf %174 : vector<8x32xf32> to vector<8x32xbf16>
    %cst_71 = arith.constant dense<0.000000e+00> : vector<8x8xf32>
    %176 = tpu.matmul %165, %173, %cst_71 {dimension_numbers = #tpu.dot_dimension_numbers<[1], [1], [0], [0], [0, 0, 1, 0], [], []>} : vector<8x32xbf16>, vector<8x32xbf16>, vector<8x8xf32> -> vector<8x8xf32>
    %cst_72 = arith.constant dense<0xFF800000> : vector<8xf32>
    %177 = vector.multi_reduction <maximumf>, %176, %cst_72 [1] : vector<8x8xf32> to vector<8xf32>
    %178 = vector.shape_cast %177 : vector<8xf32> to vector<8x1xf32>
    %179 = vector.broadcast %178 : vector<8x1xf32> to vector<8x8xf32>
    %180 = arith.subf %176, %179 : vector<8x8xf32>
    %181 = math.exp %180 : vector<8x8xf32>
    %cst_73 = arith.constant dense<0.000000e+00> : vector<8xf32>
    %182 = vector.multi_reduction <add>, %181, %cst_73 [1] : vector<8x8xf32> to vector<8xf32>
    %183 = vector.shape_cast %182 : vector<8xf32> to vector<8x1xf32>
    %184 = tpu.reciprocal %183 {approx = true} : vector<8x1xf32> -> vector<8x1xf32>
    %185 = vector.broadcast %184 : vector<8x1xf32> to vector<8x8xf32>
    %186 = arith.mulf %181, %185 : vector<8x8xf32>
    %c1 = arith.constant 1 : index
    %c0_74 = arith.constant 0 : index
    %c0_75 = arith.constant 0 : index
    %187 = vector.load %arg20[%c1, %c0_74, %c0_75] : memref<2x8x8xf32, #tpu.memory_space<vmem>>, vector<1x8x8xf32>
    %188 = vector.shape_cast %187 : vector<1x8x8xf32> to vector<8x8xf32>
    %189 = vector.shape_cast %186 : vector<8x8xf32> to vector<1x8x8xf32>
    tpu.vector_store %arg20[%c1, %c0_74, %c0_75], %189 {strides = array<i32>} : memref<2x8x8xf32, #tpu.memory_space<vmem>>, vector<1x8x8xf32>,
    %190 = arith.truncf %186 : vector<8x8xf32> to vector<8x8xbf16>
    %cst_76 = arith.constant dense<0.000000e+00> : vector<8x32xf32>
    %191 = tpu.matmul %190, %175, %cst_76 {dimension_numbers = #tpu.dot_dimension_numbers<[1], [0], [0], [1], [0, 0, 1, 1], [], []>} : vector<8x8xbf16>, vector<8x32xbf16>, vector<8x32xf32> -> vector<8x32xf32>
    %cst_77 = arith.constant dense<0.000000e+00> : vector<8x8xf32>
    %192 = tpu.matmul %171, %167, %cst_77 {dimension_numbers = #tpu.dot_dimension_numbers<[1], [1], [0], [0], [0, 0, 1, 0], [], []>} : vector<8x32xbf16>, vector<8x32xbf16>, vector<8x8xf32> -> vector<8x8xf32>
    %cst_78 = arith.constant dense<0xFF800000> : vector<8xf32>
    %193 = vector.multi_reduction <maximumf>, %192, %cst_78 [1] : vector<8x8xf32> to vector<8xf32>
    %194 = vector.shape_cast %193 : vector<8xf32> to vector<8x1xf32>
    %195 = vector.broadcast %194 : vector<8x1xf32> to vector<8x8xf32>
    %196 = arith.subf %192, %195 : vector<8x8xf32>
    %197 = math.exp %196 : vector<8x8xf32>
    %cst_79 = arith.constant dense<0.000000e+00> : vector<8xf32>
    %198 = vector.multi_reduction <add>, %197, %cst_79 [1] : vector<8x8xf32> to vector<8xf32>
    %199 = vector.shape_cast %198 : vector<8xf32> to vector<8x1xf32>
    %200 = tpu.reciprocal %199 {approx = true} : vector<8x1xf32> -> vector<8x1xf32>
    %201 = vector.broadcast %200 : vector<8x1xf32> to vector<8x8xf32>
    %202 = arith.mulf %197, %201 : vector<8x8xf32>
    %c1_80 = arith.constant 1 : index
    %c0_81 = arith.constant 0 : index
    %c0_82 = arith.constant 0 : index
    %203 = vector.load %arg21[%c1_80, %c0_81, %c0_82] : memref<2x8x8xf32, #tpu.memory_space<vmem>>, vector<1x8x8xf32>
    %204 = vector.shape_cast %203 : vector<1x8x8xf32> to vector<8x8xf32>
    %205 = vector.shape_cast %202 : vector<8x8xf32> to vector<1x8x8xf32>
    tpu.vector_store %arg21[%c1_80, %c0_81, %c0_82], %205 {strides = array<i32>} : memref<2x8x8xf32, #tpu.memory_space<vmem>>, vector<1x8x8xf32>,
    %206 = arith.truncf %202 : vector<8x8xf32> to vector<8x8xbf16>
    %cst_83 = arith.constant dense<0.000000e+00> : vector<8x32xf32>
    %207 = tpu.matmul %206, %169, %cst_83 {dimension_numbers = #tpu.dot_dimension_numbers<[1], [0], [0], [1], [0, 0, 1, 1], [], []>} : vector<8x8xbf16>, vector<8x32xbf16>, vector<8x32xf32> -> vector<8x32xf32>
    %208 = arith.truncf %191 : vector<8x32xf32> to vector<8x32xbf16>
    %cst_84 = arith.constant dense<0.000000e+00> : vector<8x32xf32>
    %209 = tpu.matmul %208, %50, %cst_84 {dimension_numbers = #tpu.dot_dimension_numbers<[1], [0], [0], [1], [0, 0, 1, 1], [], []>} : vector<8x32xbf16>, vector<32x32xbf16>, vector<8x32xf32> -> vector<8x32xf32>
    %210 = vector.broadcast %52 : vector<1x32xf32> to vector<8x32xf32>
    %211 = arith.addf %209, %210 : vector<8x32xf32>
    %212 = arith.truncf %207 : vector<8x32xf32> to vector<8x32xbf16>
    %cst_85 = arith.constant dense<0.000000e+00> : vector<8x32xf32>
    %213 = tpu.matmul %212, %51, %cst_85 {dimension_numbers = #tpu.dot_dimension_numbers<[1], [0], [0], [1], [0, 0, 1, 1], [], []>} : vector<8x32xbf16>, vector<32x32xbf16>, vector<8x32xf32> -> vector<8x32xf32>
    %214 = vector.broadcast %53 : vector<1x32xf32> to vector<8x32xf32>
    %215 = arith.addf %213, %214 : vector<8x32xf32>
    %216 = vector.extract_strided_slice %0 {offsets = [8, 0], sizes = [8, 32], strides = [1, 1]} : vector<16x32xf32> to vector<8x32xf32>
    %217 = arith.addf %211, %216 : vector<8x32xf32>
    %cst_86 = arith.constant dense<0.000000e+00> : vector<8xf32>
    %218 = vector.multi_reduction <add>, %217, %cst_86 [1] : vector<8x32xf32> to vector<8xf32>
    %219 = vector.shape_cast %218 : vector<8xf32> to vector<8x1xf32>
    %cst_87 = arith.constant 3.200000e+01 : f32
    %220 = vector.broadcast %cst_87 : f32 to vector<8x1xf32>
    %221 = arith.divf %219, %220 : vector<8x1xf32>
    %222 = vector.broadcast %221 : vector<8x1xf32> to vector<8x32xf32>
    %223 = arith.subf %217, %222 : vector<8x32xf32>
    %224 = arith.mulf %223, %223 : vector<8x32xf32>
    %cst_88 = arith.constant dense<0.000000e+00> : vector<8xf32>
    %225 = vector.multi_reduction <add>, %224, %cst_88 [1] : vector<8x32xf32> to vector<8xf32>
    %226 = vector.shape_cast %225 : vector<8xf32> to vector<8x1xf32>
    %cst_89 = arith.constant 3.200000e+01 : f32
    %227 = vector.broadcast %cst_89 : f32 to vector<8x1xf32>
    %228 = arith.divf %226, %227 : vector<8x1xf32>
    %229 = vector.broadcast %221 : vector<8x1xf32> to vector<8x32xf32>
    %230 = arith.subf %217, %229 : vector<8x32xf32>
    %cst_90 = arith.constant 9.99999974E-6 : f32
    %231 = vector.broadcast %cst_90 : f32 to vector<8x1xf32>
    %232 = arith.addf %228, %231 : vector<8x1xf32>
    %233 = math.rsqrt %232 : vector<8x1xf32>
    %234 = vector.broadcast %233 : vector<8x1xf32> to vector<8x32xf32>
    %235 = arith.mulf %230, %234 : vector<8x32xf32>
    %236 = vector.broadcast %54 : vector<1x32xf32> to vector<8x32xf32>
    %237 = arith.mulf %235, %236 : vector<8x32xf32>
    %238 = vector.broadcast %55 : vector<1x32xf32> to vector<8x32xf32>
    %239 = arith.addf %237, %238 : vector<8x32xf32>
    %c1_91 = arith.constant 1 : index
    %c0_92 = arith.constant 0 : index
    %c0_93 = arith.constant 0 : index
    %240 = vector.load %arg18[%c1_91, %c0_92, %c0_93] : memref<2x8x32xf32, #tpu.memory_space<vmem>>, vector<1x8x32xf32>
    %241 = vector.shape_cast %240 : vector<1x8x32xf32> to vector<8x32xf32>
    %242 = vector.shape_cast %239 : vector<8x32xf32> to vector<1x8x32xf32>
    tpu.vector_store %arg18[%c1_91, %c0_92, %c0_93], %242 {strides = array<i32>} : memref<2x8x32xf32, #tpu.memory_space<vmem>>, vector<1x8x32xf32>,
    %243 = vector.extract_strided_slice %1 {offsets = [8, 0], sizes = [8, 32], strides = [1, 1]} : vector<16x32xf32> to vector<8x32xf32>
    %244 = arith.addf %215, %243 : vector<8x32xf32>
    %cst_94 = arith.constant dense<0.000000e+00> : vector<8xf32>
    %245 = vector.multi_reduction <add>, %244, %cst_94 [1] : vector<8x32xf32> to vector<8xf32>
    %246 = vector.shape_cast %245 : vector<8xf32> to vector<8x1xf32>
    %cst_95 = arith.constant 3.200000e+01 : f32
    %247 = vector.broadcast %cst_95 : f32 to vector<8x1xf32>
    %248 = arith.divf %246, %247 : vector<8x1xf32>
    %249 = vector.broadcast %248 : vector<8x1xf32> to vector<8x32xf32>
    %250 = arith.subf %244, %249 : vector<8x32xf32>
    %251 = arith.mulf %250, %250 : vector<8x32xf32>
    %cst_96 = arith.constant dense<0.000000e+00> : vector<8xf32>
    %252 = vector.multi_reduction <add>, %251, %cst_96 [1] : vector<8x32xf32> to vector<8xf32>
    %253 = vector.shape_cast %252 : vector<8xf32> to vector<8x1xf32>
    %cst_97 = arith.constant 3.200000e+01 : f32
    %254 = vector.broadcast %cst_97 : f32 to vector<8x1xf32>
    %255 = arith.divf %253, %254 : vector<8x1xf32>
    %256 = vector.broadcast %248 : vector<8x1xf32> to vector<8x32xf32>
    %257 = arith.subf %244, %256 : vector<8x32xf32>
    %cst_98 = arith.constant 9.99999974E-6 : f32
    %258 = vector.broadcast %cst_98 : f32 to vector<8x1xf32>
    %259 = arith.addf %255, %258 : vector<8x1xf32>
    %260 = math.rsqrt %259 : vector<8x1xf32>
    %261 = vector.broadcast %260 : vector<8x1xf32> to vector<8x32xf32>
    %262 = arith.mulf %257, %261 : vector<8x32xf32>
    %263 = vector.broadcast %56 : vector<1x32xf32> to vector<8x32xf32>
    %264 = arith.mulf %262, %263 : vector<8x32xf32>
    %265 = vector.broadcast %57 : vector<1x32xf32> to vector<8x32xf32>
    %266 = arith.addf %264, %265 : vector<8x32xf32>
    %c1_99 = arith.constant 1 : index
    %c0_100 = arith.constant 0 : index
    %c0_101 = arith.constant 0 : index
    %267 = vector.load %arg19[%c1_99, %c0_100, %c0_101] : memref<2x8x32xf32, #tpu.memory_space<vmem>>, vector<1x8x32xf32>
    %268 = vector.shape_cast %267 : vector<1x8x32xf32> to vector<8x32xf32>
    %269 = vector.shape_cast %266 : vector<8x32xf32> to vector<1x8x32xf32>
    tpu.vector_store %arg19[%c1_99, %c0_100, %c0_101], %269 {strides = array<i32>} : memref<2x8x32xf32, #tpu.memory_space<vmem>>, vector<1x8x32xf32>,
    return
  }
  func.func @transform_0(%arg0: i32) -> (i32, i32) {
    %c0_i32 = arith.constant 0 : i32
    %c0_i32_0 = arith.constant 0 : i32
    %c0_i32_1 = arith.constant 0 : i32
    return %c0_i32, %c0_i32_0 : i32, i32
  }
  func.func @transform_1(%arg0: i32) -> (i32, i32) {
    %c0_i32 = arith.constant 0 : i32
    %c0_i32_0 = arith.constant 0 : i32
    %c0_i32_1 = arith.constant 0 : i32
    return %c0_i32, %c0_i32_0 : i32, i32
  }
  func.func @transform_2(%arg0: i32) -> (i32, i32) {
    %c0_i32 = arith.constant 0 : i32
    %c0_i32_0 = arith.constant 0 : i32
    %c0_i32_1 = arith.constant 0 : i32
    return %c0_i32, %c0_i32_0 : i32, i32
  }
  func.func @transform_3(%arg0: i32) -> (i32, i32) {
    %c0_i32 = arith.constant 0 : i32
    %c0_i32_0 = arith.constant 0 : i32
    %c0_i32_1 = arith.constant 0 : i32
    return %c0_i32, %c0_i32_0 : i32, i32
  }
  func.func @transform_4(%arg0: i32) -> (i32, i32) {
    %c0_i32 = arith.constant 0 : i32
    %c0_i32_0 = arith.constant 0 : i32
    %c0_i32_1 = arith.constant 0 : i32
    return %c0_i32, %c0_i32_0 : i32, i32
  }
  func.func @transform_5(%arg0: i32) -> (i32, i32) {
    %c0_i32 = arith.constant 0 : i32
    %c0_i32_0 = arith.constant 0 : i32
    %c0_i32_1 = arith.constant 0 : i32
    return %c0_i32, %c0_i32_0 : i32, i32
  }
  func.func @transform_6(%arg0: i32) -> (i32, i32) {
    %c0_i32 = arith.constant 0 : i32
    %c0_i32_0 = arith.constant 0 : i32
    %c0_i32_1 = arith.constant 0 : i32
    return %c0_i32, %c0_i32_0 : i32, i32
  }
  func.func @transform_7(%arg0: i32) -> (i32, i32) {
    %c0_i32 = arith.constant 0 : i32
    %c0_i32_0 = arith.constant 0 : i32
    %c0_i32_1 = arith.constant 0 : i32
    return %c0_i32, %c0_i32_0 : i32, i32
  }
  func.func @transform_8(%arg0: i32) -> (i32, i32) {
    %c0_i32 = arith.constant 0 : i32
    %c0_i32_0 = arith.constant 0 : i32
    %c0_i32_1 = arith.constant 0 : i32
    return %c0_i32, %c0_i32_0 : i32, i32
  }
  func.func @transform_9(%arg0: i32) -> (i32, i32) {
    %c0_i32 = arith.constant 0 : i32
    %c0_i32_0 = arith.constant 0 : i32
    %c0_i32_1 = arith.constant 0 : i32
    return %c0_i32, %c0_i32_0 : i32, i32
  }
  func.func @transform_10(%arg0: i32) -> (i32, i32) {
    %c0_i32 = arith.constant 0 : i32
    %c0_i32_0 = arith.constant 0 : i32
    %c0_i32_1 = arith.constant 0 : i32
    return %c0_i32, %c0_i32_0 : i32, i32
  }
  func.func @transform_11(%arg0: i32) -> (i32, i32) {
    %c0_i32 = arith.constant 0 : i32
    %c0_i32_0 = arith.constant 0 : i32
    %c0_i32_1 = arith.constant 0 : i32
    return %c0_i32, %c0_i32_0 : i32, i32
  }
  func.func @transform_12(%arg0: i32) -> (i32, i32) {
    %c0_i32 = arith.constant 0 : i32
    %c0_i32_0 = arith.constant 0 : i32
    %c0_i32_1 = arith.constant 0 : i32
    return %c0_i32, %c0_i32_0 : i32, i32
  }
  func.func @transform_13(%arg0: i32) -> (i32, i32) {
    %c0_i32 = arith.constant 0 : i32
    %c0_i32_0 = arith.constant 0 : i32
    %c0_i32_1 = arith.constant 0 : i32
    return %c0_i32, %c0_i32_0 : i32, i32
  }
  func.func @transform_14(%arg0: i32) -> (i32, i32) {
    %c0_i32 = arith.constant 0 : i32
    %c0_i32_0 = arith.constant 0 : i32
    %c0_i32_1 = arith.constant 0 : i32
    return %c0_i32, %c0_i32_0 : i32, i32
  }
  func.func @transform_15(%arg0: i32) -> (i32, i32) {
    %c0_i32 = arith.constant 0 : i32
    %c0_i32_0 = arith.constant 0 : i32
    %c0_i32_1 = arith.constant 0 : i32
    return %c0_i32, %c0_i32_0 : i32, i32
  }
  func.func @transform_16(%arg0: i32) -> (i32, i32) {
    %c0_i32 = arith.constant 0 : i32
    %c0_i32_0 = arith.constant 0 : i32
    %c0_i32_1 = arith.constant 0 : i32
    return %c0_i32, %c0_i32_0 : i32, i32
  }
  func.func @transform_17(%arg0: i32) -> (i32, i32, i32) {
    %c0_i32 = arith.constant 0 : i32
    %c0_i32_0 = arith.constant 0 : i32
    %c0_i32_1 = arith.constant 0 : i32
    %c0_i32_2 = arith.constant 0 : i32
    return %c0_i32, %c0_i32_0, %c0_i32_1 : i32, i32, i32
  }
  func.func @transform_18(%arg0: i32) -> (i32, i32, i32) {
    %c0_i32 = arith.constant 0 : i32
    %c0_i32_0 = arith.constant 0 : i32
    %c0_i32_1 = arith.constant 0 : i32
    %c0_i32_2 = arith.constant 0 : i32
    return %c0_i32, %c0_i32_0, %c0_i32_1 : i32, i32, i32
  }
  func.func @transform_19(%arg0: i32) -> (i32, i32, i32) {
    %c0_i32 = arith.constant 0 : i32
    %c0_i32_0 = arith.constant 0 : i32
    %c0_i32_1 = arith.constant 0 : i32
    %c0_i32_2 = arith.constant 0 : i32
    return %c0_i32, %c0_i32_0, %c0_i32_1 : i32, i32, i32
  }
  func.func @transform_20(%arg0: i32) -> (i32, i32, i32) {
    %c0_i32 = arith.constant 0 : i32
    %c0_i32_0 = arith.constant 0 : i32
    %c0_i32_1 = arith.constant 0 : i32
    %c0_i32_2 = arith.constant 0 : i32
    return %c0_i32, %c0_i32_0, %c0_i32_1 : i32, i32, i32
  }
}

</mosaic_0001>

<bundles_post_ra>
// kernel: tpu_custom_call.1
= control target key start
LH: loop header
LB: loop body
LE: loop exit
PB: predicated region body
PF: predicated region fallthrough
CT: control target
= control target key end

     0   :  { %s1983_s0 = inlined_call_operand.hbm [shape: f32[16,32], index: 0, kind: input, shape index: {}]   ;;  %s1984_s1 = inlined_call_operand.hbm [shape: f32[16,32], index: 1, kind: input, shape index: {}]   ;;  %s1985_s2 = inlined_call_operand.hbm [shape: bf16[32,192], index: 2, kind: input, shape index: {}]   ;;  %s1986_s3 = inlined_call_operand.vmem [shape: f32[1,192], index: 3, kind: input, shape index: {}]   ;;  %s1987_s4 = inlined_call_operand.hbm [shape: bf16[32,192], index: 4, kind: input, shape index: {}]   ;;  %s1988_s5 = inlined_call_operand.vmem [shape: f32[1,192], index: 5, kind: input, shape index: {}]   ;;  %s1989_s6 = inlined_call_operand.hbm [shape: bf16[32,32], index: 6, kind: input, shape index: {}]   ;;  %s1990_s7 = inlined_call_operand.vmem [shape: f32[1,32], index: 7, kind: input, shape index: {}]   ;;  %s1991_s8 = inlined_call_operand.hbm [shape: bf16[32,32], index: 8, kind: input, shape index: {}]   ;;  %s1992_s9 = inlined_call_operand.vmem [shape: f32[1,32], index: 9, kind: input, shape index: {}]   ;;  %s1993_s10 = inlined_call_operand.vmem [shape: f32[1,32], index: 10, kind: input, shape index: {}]   ;;  %s1994_s11 = inlined_call_operand.vmem [shape: f32[1,32], index: 11, kind: input, shape index: {}]   ;;  %s1995_s12 = inlined_call_operand.vmem [shape: f32[1,32], index: 12, kind: input, shape index: {}]   ;;  %s1996_s13 = inlined_call_operand.vmem [shape: f32[1,32], index: 13, kind: input, shape index: {}]   ;;  %s1997_s14 = inlined_call_operand.hbm [shape: f32[16,32], index: 14, kind: output, shape index: {0}]   ;;  %s1998_s15 = inlined_call_operand.hbm [shape: f32[16,32], index: 15, kind: output, shape index: {1}]   ;;  %s1999_s16 = inlined_call_operand.hbm [shape: f32[16,32], index: 16, kind: output, shape index: {2}]   ;;  %s2000_s17 = inlined_call_operand.hbm [shape: f32[2,8,32], index: 17, kind: output, shape index: {3}]   ;;  %s2001_s18 = inlined_call_operand.hbm [shape: f32[2,8,32], index: 18, kind: output, shape index: {4}]   ;;  %s2002_s19 = inlined_call_operand.hbm [shape: f32[2,8,8], index: 19, kind: output, shape index: {5}]   ;;  %s2003_s20 = inlined_call_operand.hbm [shape: f32[2,8,8], index: 20, kind: output, shape index: {6}]  }
   0x1   :  { %2004 = sst [smem:[#allocation31_spill]] %s1983_s0 }
   0x2   :  { %2005 = sst [smem:[#allocation32_spill]] %s1984_s1 }
   0x3   :  { %2006 = sst [smem:[#allocation33_spill]] %s1985_s2 }
   0x4   :  { %2007 = sst [smem:[#allocation34_spill]] %s1986_s3 }
   0x5   :  { %2008 = sst [smem:[#allocation35_spill]] %s1987_s4 }
   0x6   :  { %2009 = sst [smem:[#allocation36_spill]] %s1999_s16 }
   0x7   :  { %2010 = sst [smem:[#allocation37_spill]] %s2001_s18 }
   0x8   :  { %26 = vsyncpa [#allocation3], 0 }
   0x9   :  { %27 = vsyncpa [#allocation6], 0 }
   0xa   :  { %28 = vsyncpa [#allocation9], 0 }
   0xb   :  { %29 = vsyncpa [#allocation12], 0 }
   0xc   :  { %30 = vsyncpa [#allocation4], 0 }
   0xd   :  { %31 = vsyncpa [#allocation15], 0 }
   0xe   :  { %32 = vsyncpa [#allocation18], 0 }
   0xf   :  { %33 = vsyncpa [#allocation21], 0  ;;  %s2011_s23 = sld [smem:[#allocation32_spill]]  ;;  %s1560_s2 = smov [#allocation5]  }
  0x10   :  { %s53_s25 = sshll.u32 %s1560_s2, 4  ;;  %s2012_s27 = sld [smem:[#allocation35_spill]]  ;;  %s54_s25 = int_to_ptr.vmem [resolvable:$true] %s53_s25 }
  0x11   :  { %s1561_s4 = smov 128   ;;  %s1562_s29 = smov 8  }
  0x12   :  { %s1563_s30 = smov [#allocation8]   ;;  %s2013_s22 = sld [smem:[#allocation31_spill]] }
  0x13   :  { %s81_s0 = sshll.u32 %s1563_s30, 4  ;;  %s2014_s26 = sld [smem:[#allocation33_spill]]  ;;  %s82_s0 = int_to_ptr.vmem [resolvable:$true] %s81_s0 }
  0x14   :  { %s1564_s18 = smov [#allocation2]   ;;  %s94_s1 = sshll.u32 %s1989_s6, 4  ;;  %s95_s1 = int_to_ptr.hbm [resolvable:$true] %s94_s1 }
  0x15   :  { %s51_s24 = sshll.u32 %s2011_s23, 4  ;;  %s40_s16 = sshll.u32 %s1564_s18, 4  ;;  %s52_s24 = int_to_ptr.hbm [resolvable:$true] %s51_s24  ;;  %s41_s16 = int_to_ptr.vmem [resolvable:$true] %s40_s16 }
  0x16   :  { %s79_s28 = sshll.u32 %s2012_s27, 4  ;;  %s109_s2 = sshll.u32 %s1991_s8, 4  ;;  %s80_s28 = int_to_ptr.hbm [resolvable:$true] %s79_s28  ;;  %s110_s2 = int_to_ptr.hbm [resolvable:$true] %s109_s2 }
  0x17   :  { %59 = dma.hbm_to_vmem [thread:$0]  %s52_s24, 256, %s54_s25, [#allocation6], %s1561_s4, %s1561_s4, %s1562_s29  }
  0x18   :  { %s38_s23 = sshll.u32 %s2013_s22, 4  ;;  %s1565_s24 = smov [#allocation7]   ;;  %s39_s23 = int_to_ptr.hbm [resolvable:$true] %s38_s23 }
  0x19   :  { %87 = dma.hbm_to_vmem [thread:$0]  %s80_s28, 512, %s82_s0, [#allocation9], %s1561_s4, %s1561_s4, %s1562_s29  }
  0x1a   :  { %s64_s27 = sshll.u32 %s2014_s26, 4  ;;  %s66_s25 = sshll.u32 %s1565_s24, 4  ;;  %s65_s27 = int_to_ptr.hbm [resolvable:$true] %s64_s27  ;;  %s67_s25 = int_to_ptr.vmem [resolvable:$true] %s66_s25 }
  0x1b   :  { %46 = dma.hbm_to_vmem [thread:$0]  %s39_s23, 256, %s41_s16, [#allocation3], %s1561_s4, %s1561_s4, %s1562_s29  }
  0x1c   :  { %72 = dma.hbm_to_vmem [thread:$0]  %s65_s27, 512, %s67_s25, [#allocation6], %s1561_s4, %s1561_s4, %s1562_s29  }
  0x1d   :  { %s1566_s28 = smov [#allocation10]   ;;  %s1567_s16 = smov 64  }
  0x1e   :  { %s96_s18 = sshll.u32 %s1566_s28, 4  ;;  %s1568_s23 = smov 4   ;;  %s97_s18 = int_to_ptr.vmem [resolvable:$true] %s96_s18 }
  0x1f   :  { %102 = dma.hbm_to_vmem [thread:$0]  %s95_s1, 256, %s97_s18, [#allocation9], %s1567_s16, %s1567_s16, %s1568_s23  }
  0x20   :  { %s1569_s6 = smov [#allocation11]  }
  0x21   :  { %s111_s3 = sshll.u32 %s1569_s6, 4  ;;  %s112_s3 = int_to_ptr.vmem [resolvable:$true] %s111_s3 }
  0x22   :  { %117 = dma.hbm_to_vmem [thread:$0]  %s110_s2, 256, %s112_s3, [#allocation12], %s1567_s16, %s1567_s16, %s1568_s23  }
  0x23   :  { %1544 = dma.done.wait [#allocation3], 256  }
  0x24   :  { %1545 = vsyncadd [#allocation3], 4294967040 }
  0x25   :  { %1546 = dma.done.wait [#allocation6], 768  }
  0x26   :  { %1547 = vsyncadd [#allocation6], 4294966528 }
  0x27   :  { %1548 = dma.done.wait [#allocation9], 768  }
  0x28   :  { %1549 = vsyncadd [#allocation9], 4294966528 }
  0x29   :  { %1550 = dma.done.wait [#allocation12], 256  }
  0x2a   :  { %1551 = vsyncadd [#allocation12], 4294967040  ;;  %v1085_v0 = vld [vmem:[#allocation7 + $0x10] sm:$0xf]  ;;  %v1148_v1 = vld [vmem:[#allocation7 + $0x14] sm:$0xf0] }
  0x2b   :  { %v1103_v2 = vld [vmem:[#allocation8 + $0x10] sm:$0xf]  ;;  %v1086_v3 = vor.u32 %v1148_v1, %v1085_v0  ;;  %v1152_v4 = vld [vmem:[#allocation8 + $0x14] sm:$0xf0]  ;;  %v1077_v5 = vld [vmem:[#allocation7] sm:$0xf] }
  0x2c   :  { %v1146_v6 = vld [vmem:[#allocation7 + $0x4] sm:$0xf0]  ;;  %v1104_v7 = vor.u32 %v1152_v4, %v1103_v2  ;;  %v1095_v8 = vld [vmem:[#allocation8] sm:$0xf]  ;;  %v1724_v13 = vld [vmem:[#allocation5] sm:$0xff]  ;;  %vm188_vm0 = vcmask 261120  }
  0x2d   :  { %v1150_v9 = vld [vmem:[#allocation8 + $0x4] sm:$0xf0]  ;;  %198 = vmatpush.bf16.msra.mxu0 %v1086_v3  ;;  %v1078_v10 = vor.u32 %v1146_v6, %v1077_v5  ;;  %v1720_v11 = vld [vmem:[#allocation2] sm:$0xff]  ;;  %v1726_v15 = vld [vmem:[#allocation5 + $0x8] sm:$0xff]  ;;  %s2015_s27 = sld [smem:[#allocation34_spill]]  ;;  %s1570_s30 = smov 96  }
  0x2e   :  { %v1722_v12 = vld [vmem:[#allocation2 + $0x8] sm:$0xff]  ;;  %260 = vmatpush.bf16.msra.mxu2 %v1104_v7  ;;  %v1096_v14 = vor.u32 %v1150_v9, %v1095_v8  ;;  %v1732_v17 = vpack.c.bf16 %v1726_v15, %v1724_v13  ;;  %v1147_v20 = vld [vmem:[#allocation7 + $0x14] sm:$0xf]  ;;  %v1087_v21 = vld [vmem:[#allocation7 + $0x18] sm:$0xf0]  ;;  %vm536_vm1 = vcmask 1043456  }
  0x2f   :  { %v157_v16 = vpack.c.bf16 %v1722_v12, %v1720_v11  ;;  %v1090_v23 = vor.u32 %v1147_v20, %v1087_v21  ;;  %v1746_v25 = vld [vmem:[%s1988_s5] sm:$0x3]  ;;  %v1145_v39 = vld [vmem:[#allocation7 + $0x4] sm:$0xf]  ;;  %v1079_v40 = vld [vmem:[#allocation7 + $0x8] sm:$0xf0] }
  0x30   :  { %v227_v27 = vperm.slane %v1746_v25, 0  ;;  %v1082_v41 = vor.u32 %v1145_v39, %v1079_v40  ;;  %v1154_v48 = vld [vmem:[#allocation10 + $0x8] sm:$0xff]  ;;  %v1153_v51 = vld [vmem:[#allocation10] sm:$0xff]  ;;  %vm517_vm2 = vcmask 64512   ;;  %v1151_v8 = vld [vmem:[#allocation8 + $0x14] sm:$0xf] }
  0x31   :  { %199 = vmatpush.bf16.msra.mxu0 %v1078_v10  ;;  %212 = vmatpush.bf16.msra.mxu1 %v1090_v23  ;;  %v1105_v9 = vld [vmem:[#allocation8 + $0x18] sm:$0xf0]  ;;  %v1149_v10 = vld [vmem:[#allocation8 + $0x4] sm:$0xf]  ;;  %v1792_v23 = vld [vmem:[#allocation11] sm:$0xff]  ;;  %s993_s3 = sshll.u32 %s2000_s17, 4  ;;  %s994_s3 = int_to_ptr.hbm [resolvable:$true] %s993_s3 }
  0x32   :  { %261 = vmatpush.bf16.msra.mxu2 %v1096_v14  ;;  %v1108_v14 = vor.u32 %v1151_v8, %v1105_v9  ;;  %v1789_v21 = vld [vmem:[#allocation11 + $0x8] sm:$0xff]  ;;  %s1575_s24 = smov [#allocation20]   ;;  %s1576_s17 = smov [#allocation13]  }
  0x33   :  { %v1740_v18 = vld [vmem:[%s2015_s27] sm:$0x3]  ;;  %s1019_s27 = sshll.u32 %s2002_s19, 4  ;;  %s1017_s25 = sshll.u32 %s1575_s24, 4  ;;  %s1020_s27 = int_to_ptr.hbm [resolvable:$true] %s1019_s27  ;;  %s1018_s25 = int_to_ptr.vmem [resolvable:$true] %s1017_s25 }
  0x34   :  { %1091 = vmatmul.msk.bf16.vlgmr.msra.gmra.mxu0 %vm188_vm0, %v157_v16  ;;  %v164_v19 = vperm.slane %v1740_v18, 0  ;;  %274 = vmatpush.bf16.msra.mxu3 %v1108_v14  ;;  %v165_v39 = vperm.slane %v1740_v18, 1  ;;  %s954_s1 = sshll.u32 %s1997_s14, 4  ;;  %s1577_s18 = smov [#allocation22]   ;;  %s955_s1 = int_to_ptr.hbm [resolvable:$true] %s954_s1 }
  0x35   :  { %1109 = vmatmul.msk.bf16.vlgmr.msra.gmra.mxu2 %vm188_vm0, %v1732_v17  ;;  %213 = vmatpush.bf16.msra.mxu1 %v1082_v41  ;;  %v228_v41 = vperm.slane %v1746_v25, 1  ;;  %s1030_s0 = sshll.u32 %s1577_s18, 4  ;;  %s1578_s14 = smov [#allocation14]   ;;  %s1031_s0 = int_to_ptr.vmem [resolvable:$true] %s1030_s0 }
  0x36   :  { %s2017_s26 = sld [smem:[#allocation37_spill]] }
  0x38   :  { %1092 = vmatmul.msk.bf16.vlgmr.msra.gmra.mxu1 %vm188_vm0, %v157_v16  ;;  %v1097_v16 = vld [vmem:[#allocation8 + $0x8] sm:$0xf0] }
  0xb1   :  { %v201_v22 = vpop.f32.mrf.mxu0 }
  0xb2   :  { %v202_v24 = vadd.f32 %v201_v22, %v164_v19 }
  0xb4   :  { %v1748_v26 = vpack.c.bf16 %v202_v24, %v202_v24 }
  0xb6   :  { %554 = vrot.lane.b32.xlu1 %v1748_v26, %s1570_s30 }
  0xb8   :  { %v263_v28 = vpop.f32.mrf.mxu2 }
  0xb9   :  { %v264_v29 = vadd.f32 %v263_v28, %v227_v27  ;;  %v203_v32 = vpop.f32.mrf.mxu0 }
  0xba   :  { %v204_v33 = vadd.f32 %v203_v32, %v164_v19  ;;  %v1100_v19 = vor.u32 %v1149_v10, %v1097_v16 }
  0xbb   :  { %v1753_v30 = vadd.f32 %v264_v29, %v202_v24  ;;  %v494_v31 = vpack.c.bf16 %v264_v29, %v264_v29 }
  0xbc   :  { %v1763_v38 = vpack.c.bf16 %v204_v33, %v204_v33  ;;  %275 = vmatpush.bf16.msra.mxu3 %v1100_v19 }
  0xbd   :  { %531 = vrot.lane.b32.xlu2 %v494_v31, %s1567_s16  ;;  %496 = vrot.lane.b32.xlu0 %v494_v31, %s1570_s30 }
  0xbf   :  { %1110 = vmatmul.msk.bf16.vlgmr.msra.gmra.mxu3 %vm188_vm0, %v1732_v17 }
  0xc0   :  { %v265_v34 = vpop.f32.mrf.mxu2 }
  0xc1   :  { %v266_v35 = vadd.f32 %v265_v34, %v227_v27 }
  0xc3   :  { %v1757_v36 = vadd.f32 %v266_v35, %v204_v33  ;;  %v1759_v37 = vpack.c.bf16 %v266_v35, %v266_v35 }
  0xc5   :  { %747 = vrot.lane.b32.xlu2 %v1759_v37, %s1570_s30 }
  0xcd   :  { %804 = vrot.lane.b32.xlu2 %v1763_v38, %s1570_s30 }
 0x117   :  { %v532_v42 = vpop.permute.xlu2 %531 }
 0x118   :  { %v538_v43 = vsel %vm536_vm1, %v532_v42, 0 }
 0x119   :  { %547 = vmatpush.bf16.msrb.mxu1 %v538_v43 }
 0x11d   :  { %666 = vmatpush.bf16.msra.mxu1 %v1789_v21 }
 0x11f   :  { %v748_v44 = vpop.permute.xlu2 %747 }
 0x120   :  { %v753_v47 = vsel %vm188_vm0, %v748_v44, 0  ;;  %v215_v44 = vpop.f32.mrf.mxu1 }
 0x121   :  { %667 = vmatpush.bf16.msra.mxu1 %v1792_v23 }
 0x127   :  { %v805_v52 = vpop.permute.xlu2 %804 }
 0x128   :  { %v555_v45 = vpop.permute.xlu1 %554  ;;  %v810_v53 = vsel %vm188_vm0, %v805_v52, 0 }
 0x129   :  { %v560_v46 = vsel %vm188_vm0, %v555_v45, 0 }
 0x12a   :  { %569 = vmatpush.bf16.xpose.msrb.mxu2 %v560_v46 }
 0x12f   :  { %v497_v49 = vpop.permute.xlu0 %496 }
 0x130   :  { %v502_v50 = vsel %vm188_vm0, %v497_v49, 0 }
 0x131   :  { %511 = vmatpush.bf16.xpose.msrb.mxu0 %v502_v50  ;;  %1119 = vmatmul.msk.bf16.vlgmr.msrb.gmra.mxu2 %vm188_vm0, %v494_v31 }
 0x132   :  { %762 = vmatpush.bf16.xpose.msra.mxu2 %v753_v47  ;;  %v216_v47 = vadd.f32 %v215_v44, %v165_v39 }
 0x138   :  { %1117 = vmatmul.msk.bf16.vlgmr.msrb.gmra.mxu0 %vm188_vm0, %v1748_v26 }
 0x139   :  { %634 = vmatpush.bf16.msra.mxu0 %v1154_v48 }
 0x13a   :  { %870 = vmatpush.bf16.msrb.mxu2 %v1154_v48 }
 0x13d   :  { %635 = vmatpush.bf16.msra.mxu0 %v1153_v51 }
 0x13e   :  { %871 = vmatpush.bf16.msrb.mxu2 %v1153_v51 }
 0x141   :  { %819 = vmatpush.bf16.xpose.msrb.mxu0 %v810_v53  ;;  %1139 = vmatmul.msk.bf16.vlgmr.msra.gmra.mxu2 %vm188_vm0, %v1763_v38 }
 0x142   :  { %v277_v48 = vpop.f32.mrf.mxu3 }
 0x143   :  { %v278_v49 = vadd.f32 %v277_v48, %v228_v41 }
 0x145   :  { %v1806_v52 = vadd.f32 %v278_v49, %v216_v47 }
 0x1b4   :  { %v571_v54 = vpop.f32.mrf.mxu2 }
 0x1b5   :  { %v513_v55 = vpop.f32.mrf.mxu0  ;;  %v575_v56 = vsel %vm517_vm2, %v571_v54, -inf }
 0x1b6   :  { %576 = vmax.xlane.f32.xlu2 %v575_v56  ;;  %v518_v57 = vsel %vm517_vm2, %v513_v55, -inf }
 0x1b7   :  { %519 = vmax.xlane.f32.xlu0 %v518_v57 }
 0x1bc   :  { %v573_v58 = vpop.f32.mrf.mxu2 }
 0x1bd   :  { %v515_v59 = vpop.f32.mrf.mxu0 }
 0x1c4   :  { %v764_v60 = vpop.f32.mrf.mxu2 }
 0x1c5   :  { %v768_v20 = vsel %vm517_vm2, %v764_v60, -inf }
 0x1cc   :  { %v766_v61 = vpop.f32.mrf.mxu2 }
 0x229   :  { %v577_v62 = vpop.xlane.xlu2 %576 }
 0x22a   :  { %v578_v63 = vsub.f32 %v571_v54, %v577_v62  ;;  %v520_v0 = vpop.xlane.xlu0 %519 }
 0x22b   :  { %v521_v1 = vsub.f32 %v513_v55, %v520_v0  ;;  %v279_v0 = vpop.f32.mrf.mxu3 }
 0x22c   :  { %v579_v2 = vmul.f32 1.442695, %v578_v63  ;;  %v217_v63 = vpop.f32.mrf.mxu1 }
 0x22d   :  { %v522_v3 = vmul.f32 1.442695, %v521_v1 }
 0x22e   :  { %1184 = vpow2.f32 %v579_v2  ;;  %v218_v2 = vadd.f32 %v217_v63, %v165_v39 }
 0x22f   :  { %1186 = vpow2.f32 %v522_v3  ;;  %v280_v3 = vadd.f32 %v279_v0, %v228_v41 }
 0x231   :  { %v1816_v8 = vadd.f32 %v280_v3, %v218_v2 }
 0x233   :  { %v1114_v14 = vmul.f32 -1.442695, %v1816_v8 }
 0x234   :  { %v1185_v4 = vpop.eup %1184 }
 0x235   :  { %v1187_v5 = vpop.eup %1186  ;;  %v581_v6 = vsel %vm517_vm2, %v1185_v4, 0.0 }
 0x236   :  { %582 = vadd.xlane.f32.xlu0 %v581_v6  ;;  %v524_v7 = vsel %vm517_vm2, %v1187_v5, 0.0 }
 0x237   :  { %525 = vadd.xlane.f32.xlu1 %v524_v7  ;;  %v1113_v7 = vmul.f32 -1.442695, %v1806_v52 }
 0x23e   :  { %769 = vmax.xlane.f32.xlu0 %v768_v20 }
 0x250   :  { %588 = vrot.lane.b32.xlu1 %v1748_v26, %s1567_s16 }
 0x258   :  { %839 = vrot.lane.b32.xlu1 %v1763_v38, %s1567_s16  ;;  %v1571_v38 = vmov 1.4142135  }
 0x2a9   :  { %v583_v22 = vpop.xlane.xlu0 %582 }
 0x2aa   :  { %v526_v24 = vpop.xlane.xlu1 %525  ;;  %1188 = vrcp.f32 %v583_v22 }
 0x2ab   :  { %1190 = vrcp.f32 %v526_v24 }
 0x2b0   :  { %v1189_v27 = vpop.eup %1188 }
 0x2b1   :  { %v1191_v17 = vpop.eup %1190  ;;  %v585_v28 = vmul.f32 %v1189_v27, %v1185_v4  ;;  %v770_v29 = vpop.xlane.xlu0 %769 }
 0x2b2   :  { %v528_v26 = vmul.f32 %v1191_v17, %v1187_v5  ;;  %v771_v31 = vsub.f32 %v764_v60, %v770_v29 }
 0x2b3   :  { %586 = vst.msk [vmem:[#allocation22] sm:$0xff] %vm517_vm2, %v585_v28  ;;  %v587_v46 = vpack.c.bf16 %v585_v28, %v585_v28 }
 0x2b4   :  { %529 = vst.msk [vmem:[#allocation20] sm:$0xff] %vm517_vm2, %v528_v26  ;;  %v772_v32 = vmul.f32 1.442695, %v771_v31  ;;  %v530_v33 = vpack.c.bf16 %v528_v26, %v528_v26 }
 0x2b6   :  { %1192 = vpow2.f32 %v772_v32  ;;  %1118 = vmatmul.msk.bf16.vlgmr.msrb.gmra.mxu1 %vm517_vm2, %v530_v33 }
 0x2b7   :  { %1194 = vrcp.f32 %v1571_v38 }
 0x2b8   :  { %1196 = vpow2.f32 %v1113_v7 }
 0x2bc   :  { %v1798_v34 = vpop.eup %1192 }
 0x2bd   :  { %v774_v35 = vsel %vm517_vm2, %v1798_v34, 0.0  ;;  %v1195_v42 = vpop.eup %1194 }
 0x2be   :  { %775 = vadd.xlane.f32.xlu0 %v774_v35  ;;  %v377_v45 = vmul.f32 1.4142135, %v1195_v42  ;;  %vm381_vm3 = vweird.f32 %v1195_v42  ;;  %v1197_v27 = vpop.eup %1196 }
 0x2bf   :  { %v340_v32 = vadd.f32 1.0, %v1197_v27 }
 0x2c0   :  { %v378_v50 = vsub.f32 1.0, %v377_v45 }
 0x2c1   :  { %vm347_vm8 = vweird.f32 %v340_v32  ;;  %v351_v0 = vand.u32 2147483647, %v340_v32 }
 0x2c2   :  { %v589_v40 = vpop.permute.xlu1 %588  ;;  %v379_v51 = vmul.f32 %v1195_v42, %v378_v50 }
 0x2c3   :  { %v594_v43 = vsel %vm536_vm1, %v589_v40, 0  ;;  %vm352_vm13 = vcmp.eq.f32.partialorder %v351_v0, 8.507059e+37 }
 0x2c4   :  { %603 = vmatpush.bf16.msrb.mxu3 %v594_v43  ;;  %v380_v53 = vadd.f32 %v1195_v42, %v379_v51  ;;  %v374_v51 = vmul.f32 0.5, %v1806_v52 }
 0x2c6   :  { %v1809_v54 = vsel %vm381_vm3, %v1195_v42, %v380_v53 }
 0x2c7   :  { %1120 = vmatmul.msk.bf16.vlgmr.msrb.gmra.mxu3 %vm517_vm2, %v587_v46  ;;  %v383_v55 = vmul.f32 %v1809_v54, %v1806_v52 }
 0x2c9   :  { %v385_v56 = vmul.f32 %v383_v55, %v383_v55 }
 0x2ca   :  { %v840_v18 = vpop.permute.xlu1 %839 }
 0x2cb   :  { %v845_v25 = vsel %vm536_vm1, %v840_v18, 0  ;;  %v386_v57 = vmin.f32 %v385_v56, 16.0 }
 0x2cc   :  { %854 = vmatpush.bf16.msrb.mxu1 %v845_v25 }
 0x2cd   :  { %v398_v58 = vmul.f32 3.8918573e-05, %v386_v57  ;;  %v387_v6 = vmul.f32 2.1237322e-06, %v386_v57 }
 0x2cf   :  { %v399_v59 = vadd.f32 0.001143296, %v398_v58  ;;  %v388_v10 = vadd.f32 0.00028619796, %v387_v6 }
 0x2d1   :  { %v400_v60 = vmul.f32 %v399_v59, %v386_v57  ;;  %v389_v19 = vmul.f32 %v388_v10, %v386_v57 }
 0x2d2   :  { %782 = vrot.lane.b32.xlu0 %v1759_v37, %s1567_s16 }
 0x2d3   :  { %v401_v61 = vadd.f32 0.014752088, %v400_v60  ;;  %v390_v20 = vadd.f32 0.0036580483, %v389_v19 }
 0x2d5   :  { %v402_v62 = vmul.f32 %v401_v61, %v386_v57  ;;  %v391_v22 = vmul.f32 %v390_v20, %v386_v57  ;;  %v353_v61 = vand.u32 2147483648, %v340_v32 }
 0x2d7   :  { %v403_v1 = vadd.f32 0.112945676, %v402_v62  ;;  %v392_v24 = vadd.f32 0.05243302, %v391_v22 }
 0x2d9   :  { %v404_v4 = vmul.f32 %v403_v1, %v386_v57  ;;  %v393_v28 = vmul.f32 %v392_v24, %v386_v57  ;;  %v354_v1 = vor.u32 1.1754944e-38, %v353_v61 }
 0x2db   :  { %v405_v5 = vadd.f32 0.4994258, %v404_v4  ;;  %v394_v31 = vadd.f32 0.18741608, %v393_v28 }
 0x2dd   :  { %v406_v9 = vmul.f32 %v405_v5, %v386_v57  ;;  %v395_v38 = vmul.f32 %v394_v31, %v386_v57 }
 0x2df   :  { %v407_v16 = vadd.f32 1.0, %v406_v9  ;;  %v396_v41 = vadd.f32 1.1283791, %v395_v38 }
 0x2e1   :  { %1198 = vrcp.f32 %v407_v16  ;;  %v419_v40 = vand.u32 2147483648, %v407_v16  ;;  %vm413_vm4 = vweird.f32 %v407_v16  ;;  %v397_v43 = vmul.f32 %v396_v41, %v383_v55 }
 0x2e2   :  { %1200 = vpow2.f32 %v1114_v14  ;;  %v417_v44 = vand.u32 2147483647, %v407_v16 }
 0x2e3   :  { %1202 = vrcp.f32 %v340_v32  ;;  %v420_v45 = vor.u32 1.1754944e-38, %v419_v40 }
 0x2e4   :  { %vm418_vm7 = vcmp.eq.f32.partialorder %v417_v44, 8.507059e+37 }
 0x2e7   :  { %v1199_v17 = vpop.eup %1198 }
 0x2e8   :  { %v1201_v29 = vpop.eup %1200  ;;  %v409_v26 = vmul.f32 %v1199_v17, %v407_v16  ;;  %vm414_vm5 = vweird.f32 %v1199_v17 }
 0x2e9   :  { %v341_v35 = vadd.f32 1.0, %v1201_v29  ;;  %vm415_vm6 = vmor %vm413_vm4, %vm414_vm5  ;;  %v1203_v48 = vpop.eup %1202 }
 0x2ea   :  { %v410_v33 = vsub.f32 1.0, %v409_v26  ;;  %v343_v53 = vmul.f32 %v1203_v48, %v340_v32  ;;  %vm348_vm9 = vweird.f32 %v1203_v48 }
 0x2eb   :  { %1204 = vrcp.f32 %v341_v35  ;;  %v368_v62 = vand.u32 2147483648, %v341_v35  ;;  %vm349_vm10 = vmor %vm347_vm8, %vm348_vm9  ;;  %vm362_vm11 = vweird.f32 %v341_v35  ;;  %v366_v3 = vand.u32 2147483647, %v341_v35 }
 0x2ec   :  { %v411_v39 = vmul.f32 %v1199_v17, %v410_v33  ;;  %v344_v58 = vsub.f32 1.0, %v343_v53 }
 0x2ed   :  { %v369_v4 = vor.u32 1.1754944e-38, %v368_v62  ;;  %vm367_vm15 = vcmp.eq.f32.partialorder %v366_v3, 8.507059e+37  ;;  %v1853_v62 = vld [vmem:[%s1992_s9] ss:$0 sm:$0xff]  ;;  %s1032_s9 = sshll.u32 %s2003_s20, 4  ;;  %s1579_s20 = smov [#allocation16]   ;;  %s1033_s9 = int_to_ptr.hbm [resolvable:$true] %s1032_s9 }
 0x2ee   :  { %v412_v42 = vadd.f32 %v1199_v17, %v411_v39  ;;  %v345_v55 = vmul.f32 %v1203_v48, %v344_v58  ;;  %s978_s2 = sshll.u32 %s1579_s20, 4  ;;  %s979_s2 = int_to_ptr.vmem [resolvable:$true] %s978_s2 }
 0x2f0   :  { %v416_v46 = vsel %vm415_vm6, %v1199_v17, %v412_v42  ;;  %v346_v63 = vadd.f32 %v1203_v48, %v345_v55 }
 0x2f1   :  { %v421_v47 = vsel %vm418_vm7, %v420_v45, %v416_v46  ;;  %v1205_v50 = vpop.eup %1204 }
 0x2f2   :  { %v422_v49 = vmul.f32 %v421_v47, %v397_v43  ;;  %v358_v25 = vmul.f32 %v1205_v50, %v341_v35  ;;  %vm363_vm12 = vweird.f32 %v1205_v50  ;;  %v350_v52 = vsel %vm349_vm10, %v1203_v48, %v346_v63 }
 0x2f3   :  { %vm364_vm14 = vmor %vm362_vm11, %vm363_vm12  ;;  %v355_v5 = vsel %vm352_vm13, %v354_v1, %v350_v52 }
 0x2f4   :  { %v1115_v18 = vclamps-f32 %v422_v49, 1.0  ;;  %v359_v59 = vsub.f32 1.0, %v358_v25  ;;  %372 = vst.msk [vmem:[#allocation16] sm:$0xff] %vm188_vm0, %v355_v5 }
 0x2f6   :  { %v465_v56 = vadd.f32 1.0, %v1115_v18  ;;  %v360_v60 = vmul.f32 %v1205_v50, %v359_v59 }
 0x2f8   :  { %v1820_v57 = vmul.f32 %v465_v56, %v374_v51  ;;  %v361_v2 = vadd.f32 %v1205_v50, %v360_v60  ;;  %v1111_v56 = vmul.f32 -1.442695, %v1753_v30 }
 0x2fa   :  { %v365_v6 = vsel %vm364_vm14, %v1205_v50, %v361_v2 }
 0x2fb   :  { %v370_v7 = vsel %vm367_vm15, %v369_v4, %v365_v6 }
 0x2fc   :  { %373 = vst.msk [vmem:[#allocation16 + $0x8] sm:$0xff] %vm188_vm0, %v370_v7 }
 0x331   :  { %v776_v9 = vpop.xlane.xlu0 %775 }
 0x332   :  { %1206 = vrcp.f32 %v776_v9 }
 0x333   :  { %v549_v10 = vpop.f32.mrf.mxu1 }
 0x334   :  { %v609_v14 = vpack.c.bf16 %v549_v10, %v549_v10 }
 0x336   :  { %1129 = vmatmul.msk.bf16.vlgmr.msra.gmra.mxu0 %vm188_vm0, %v609_v14 }
 0x338   :  { %v1207_v16 = vpop.eup %1206 }
 0x339   :  { %v778_v19 = vmul.f32 %v1207_v16, %v1798_v34 }
 0x33b   :  { %780 = vst.msk [vmem:[#allocation20 + $0x8] sm:$0xff] %vm517_vm2, %v778_v19  ;;  %v551_v20 = vpop.f32.mrf.mxu1  ;;  %v781_v27 = vpack.c.bf16 %v778_v19, %v778_v19 }
 0x33c   :  { %1025 = dma.vmem_to_hbm [thread:$0]  %s1018_s25, 256, %s1020_s27, [#allocation21], %s1561_s4, %s1561_s4, %s1562_s29  }
 0x33d   :  { %s1006_s27 = sshll.u32 %s2017_s26, 4  ;;  %s1007_s27 = int_to_ptr.hbm [resolvable:$true] %s1006_s27 }
 0x344   :  { %v783_v22 = vpop.permute.xlu0 %782 }
 0x345   :  { %v788_v24 = vsel %vm536_vm1, %v783_v22, 0 }
 0x346   :  { %1141 = vmatmul.msk.bf16.vlgmr.msrb.gmra.mxu0 %vm188_vm0, %v1759_v37  ;;  %797 = vmatpush.bf16.msra.mxu3 %v788_v24 }
 0x349   :  { %1140 = vmatmul.msk.bf16.vlgmr.msra.gmra.mxu3 %vm517_vm2, %v781_v27 }
 0x34a   :  { %887 = vmatpush.bf16.msrb.mxu3 %v1789_v21  ;;  %v605_v17 = vpop.f32.mrf.mxu3 }
 0x34b   :  { %v641_v28 = vpack.c.bf16 %v605_v17, %v605_v17 }
 0x34d   :  { %1138 = vmatmul.msk.bf16.vlgmr.msra.gmra.mxu1 %vm188_vm0, %v641_v28 }
 0x34e   :  { %888 = vmatpush.bf16.msrb.mxu3 %v1792_v23  ;;  %v1838_v23 = vmul.f32 %v1809_v54, %v1816_v8  ;;  %v1178_v54 = vld [vmem:[%s1990_s7] ss:$0 sm:$0xff]  ;;  %s1572_s7 = smov 32  }
 0x350   :  { %v425_v40 = vmul.f32 %v1838_v23, %v1838_v23 }
 0x352   :  { %v607_v34 = vpop.f32.mrf.mxu3  ;;  %v426_v41 = vmin.f32 %v425_v40, 16.0 }
 0x354   :  { %v438_v42 = vmul.f32 3.8918573e-05, %v426_v41  ;;  %v427_v18 = vmul.f32 2.1237322e-06, %v426_v41 }
 0x356   :  { %v439_v43 = vadd.f32 0.001143296, %v438_v42  ;;  %v428_v58 = vadd.f32 0.00028619796, %v427_v18 }
 0x358   :  { %v440_v44 = vmul.f32 %v439_v43, %v426_v41  ;;  %v429_v61 = vmul.f32 %v428_v58, %v426_v41 }
 0x35a   :  { %v441_v45 = vadd.f32 0.014752088, %v440_v44  ;;  %v430_v1 = vadd.f32 0.0036580483, %v429_v61 }
 0x35c   :  { %v442_v46 = vmul.f32 %v441_v45, %v426_v41  ;;  %v431_v3 = vmul.f32 %v430_v1, %v426_v41 }
 0x35e   :  { %v443_v48 = vadd.f32 0.112945676, %v442_v46 }
 0x360   :  { %v444_v51 = vmul.f32 %v443_v48, %v426_v41 }
 0x362   :  { %v445_v53 = vadd.f32 0.4994258, %v444_v51 }
 0x364   :  { %v446_v60 = vmul.f32 %v445_v53, %v426_v41 }
 0x366   :  { %v447_v0 = vadd.f32 1.0, %v446_v60 }
 0x368   :  { %vm453_vm1 = vweird.f32 %v447_v0 }
 0x3b3   :  { %v637_v29 = vpop.f32.mrf.mxu0 }
 0x3b4   :  { %v638_v59 = vadd.f32 %v1178_v54, %v637_v29  ;;  %v459_v29 = vand.u32 2147483648, %v447_v0 }
 0x3b6   :  { %v1856_v63 = vadd.f32 %v638_v59, %v1720_v11  ;;  %v432_v11 = vadd.f32 0.05243302, %v431_v3 }
 0x3b8   :  { %v674_v2 = vsel %vm188_vm0, %v1856_v63, 0.0  ;;  %v433_v20 = vmul.f32 %v432_v11, %v426_v41 }
 0x3ba   :  { %v434_v27 = vadd.f32 0.18741608, %v433_v20 }
 0x3bb   :  { %v639_v26 = vpop.f32.mrf.mxu0 }
 0x3bc   :  { %v435_v34 = vmul.f32 %v434_v27, %v426_v41 }
 0x3c3   :  { %v821_v31 = vpop.f32.mrf.mxu0 }
 0x3c4   :  { %v825_v32 = vsel %vm517_vm2, %v821_v31, -inf }
 0x3c5   :  { %826 = vmax.xlane.f32.xlu2 %v825_v32  ;;  %v436_v32 = vadd.f32 1.1283791, %v435_v34 }
 0x3ca   :  { %v669_v37 = vpop.f32.mrf.mxu1 }
 0x3cb   :  { %v823_v33 = vpop.f32.mrf.mxu0  ;;  %v670_v30 = vadd.f32 %v1853_v62, %v669_v37  ;;  %v460_v37 = vor.u32 1.1754944e-38, %v459_v29 }
 0x3cc   :  { %v799_v35 = vpop.f32.mrf.mxu3 }
 0x3cd   :  { %v860_v38 = vpack.c.bf16 %v799_v35, %v799_v35  ;;  %v1862_v5 = vadd.f32 %v670_v30, %v1724_v13 }
 0x3cf   :  { %1143 = vmatmul.msk.bf16.vlgmr.msrb.gmra.mxu2 %vm188_vm0, %v860_v38  ;;  %v713_v10 = vsel %vm188_vm0, %v1862_v5, 0.0  ;;  %v437_v38 = vmul.f32 %v436_v32, %v1838_v23 }
 0x3d2   :  { %v671_v21 = vpop.f32.mrf.mxu1 }
 0x3d4   :  { %v801_v39 = vpop.f32.mrf.mxu3 }
 0x438   :  { %v827_v47 = vpop.xlane.xlu2 %826 }
 0x439   :  { %v828_v49 = vsub.f32 %v821_v31, %v827_v47  ;;  %v375_v47 = vmul.f32 0.5, %v1816_v8 }
 0x43b   :  { %v829_v50 = vmul.f32 1.442695, %v828_v49  ;;  %v1573_v49 = vmov 32.0  }
 0x43d   :  { %1208 = vpow2.f32 %v829_v50 }
 0x43e   :  { %1210 = vpow2.f32 %v1111_v56 }
 0x43f   :  { %1212 = vrcp.f32 %v447_v0 }
 0x443   :  { %v1845_v25 = vpop.eup %1208 }
 0x444   :  { %v831_v55 = vsel %vm517_vm2, %v1845_v25, 0.0  ;;  %v1211_v52 = vpop.eup %1210 }
 0x445   :  { %832 = vadd.xlane.f32.xlu2 %v831_v55  ;;  %v290_v4 = vadd.f32 1.0, %v1211_v52  ;;  %v1213_v6 = vpop.eup %1212 }
 0x446   :  { %v449_v16 = vmul.f32 %v1213_v6, %v447_v0  ;;  %vm454_vm3 = vweird.f32 %v1213_v6 }
 0x447   :  { %1214 = vrcp.f32 %v290_v4  ;;  %vm455_vm4 = vmor %vm453_vm1, %vm454_vm3  ;;  %v303_v40 = vand.u32 2147483648, %v290_v4  ;;  %vm297_vm7 = vweird.f32 %v290_v4  ;;  %v301_v41 = vand.u32 2147483647, %v290_v4 }
 0x448   :  { %v450_v13 = vsub.f32 1.0, %v449_v16  ;;  %1216 = vrcp.f32 %v1573_v49 }
 0x449   :  { %v304_v44 = vor.u32 1.1754944e-38, %v303_v40  ;;  %vm302_vm9 = vcmp.eq.f32.partialorder %v301_v41, 8.507059e+37  ;;  %v1182_v41 = vld [vmem:[%s1994_s11] ss:$0 sm:$0xff]  ;;  %s967_s11 = sshll.u32 %s1998_s15, 4  ;;  %s1580_s15 = smov [#allocation19]   ;;  %s968_s11 = int_to_ptr.hbm [resolvable:$true] %s967_s11 }
 0x44a   :  { %v451_v28 = vmul.f32 %v1213_v6, %v450_v13  ;;  %s1004_s6 = sshll.u32 %s1580_s15, 4  ;;  %s1005_s6 = int_to_ptr.vmem [resolvable:$true] %s1004_s6 }
 0x44c   :  { %v452_v31 = vadd.f32 %v1213_v6, %v451_v28 }
 0x44d   :  { %675 = vadd.xlane.f32.xlu2 %v674_v2  ;;  %v1215_v22 = vpop.eup %1214 }
 0x44e   :  { %v293_v17 = vmul.f32 %v1215_v22, %v290_v4  ;;  %v456_v35 = vsel %vm455_vm4, %v1213_v6, %v452_v31  ;;  %vm298_vm6 = vweird.f32 %v1215_v22  ;;  %v1217_v50 = vpop.eup %1216 }
 0x44f   :  { %vm299_vm8 = vmor %vm297_vm7, %vm298_vm6  ;;  %v678_v51 = vmul.f32 32.0, %v1217_v50  ;;  %vm682_vm10 = vweird.f32 %v1217_v50 }
 0x450   :  { %v294_v26 = vsub.f32 1.0, %v293_v17 }
 0x451   :  { %v679_v18 = vsub.f32 1.0, %v678_v51 }
 0x452   :  { %v873_v7 = vpop.f32.mrf.mxu2  ;;  %v295_v33 = vmul.f32 %v1215_v22, %v294_v26 }
 0x453   :  { %v874_v9 = vadd.f32 %v1178_v54, %v873_v7  ;;  %v680_v54 = vmul.f32 %v1217_v50, %v679_v18 }
 0x454   :  { %v296_v39 = vadd.f32 %v1215_v22, %v295_v33  ;;  %v1180_v33 = vld [vmem:[%s1993_s10] ss:$0 sm:$0xff] }
 0x455   :  { %714 = vadd.xlane.f32.xlu2 %v713_v10  ;;  %v1867_v14 = vadd.f32 %v874_v9, %v1722_v12  ;;  %v457_v12 = vand.u32 2147483647, %v447_v0  ;;  %v681_v56 = vadd.f32 %v1217_v50, %v680_v54 }
 0x456   :  { %v300_v43 = vsel %vm299_vm8, %v1215_v22, %v296_v39 }
 0x457   :  { %v895_v19 = vsel %vm188_vm0, %v1867_v14, 0.0  ;;  %vm458_vm5 = vcmp.eq.f32.partialorder %v457_v12, 8.507059e+37  ;;  %v305_v46 = vsel %vm302_vm9, %v304_v44, %v300_v43  ;;  %v1875_v58 = vsel %vm682_vm10, %v1217_v50, %v681_v56 }
 0x458   :  { %896 = vadd.xlane.f32.xlu1 %v895_v19  ;;  %v461_v21 = vsel %vm458_vm5, %v460_v37, %v456_v35 }
 0x459   :  { %v462_v42 = vmul.f32 %v461_v21, %v437_v38 }
 0x45a   :  { %v875_v24 = vpop.f32.mrf.mxu2 }
 0x45b   :  { %v1116_v45 = vclamps-f32 %v462_v42, 1.0 }
 0x45d   :  { %v466_v48 = vadd.f32 1.0, %v1116_v45 }
 0x45f   :  { %v468_v23 = vmul.f32 %v466_v48, %v375_v47 }
 0x471   :  { %324 = vrot.lane.b32.xlu1 %v305_v46, %s1572_s7 }
 0x479   :  { %473 = vrot.lane.b32.xlu1 %v468_v23, %s1570_s30 }
 0x4b8   :  { %v833_v53 = vpop.xlane.xlu2 %832 }
 0x4b9   :  { %1218 = vrcp.f32 %v833_v53 }
 0x4bf   :  { %v1219_v59 = vpop.eup %1218 }
 0x4c0   :  { %v835_v55 = vmul.f32 %v1219_v59, %v1845_v25  ;;  %v676_v8 = vpop.xlane.xlu2 %675 }
 0x4c1   :  { %v684_v60 = vmul.f32 %v1875_v58, %v676_v8 }
 0x4c2   :  { %v838_v61 = vpack.c.bf16 %v835_v55, %v835_v55  ;;  %837 = vst.msk [vmem:[#allocation22 + $0x8] sm:$0xff] %vm517_vm2, %v835_v55  ;;  %v1909_v55 = vld [vmem:[%s1995_s12] ss:$0 sm:$0xff]  ;;  %s1574_s12 = smov [#allocation17]  }
 0x4c3   :  { %v685_v0 = vsub.f32 %v1856_v63, %v684_v60  ;;  %1038 = dma.vmem_to_hbm [thread:$0]  %s1031_s0, 256, %s1033_s9, [#allocation21], %s1561_s4, %s1561_s4, %s1562_s29  }
 0x4c4   :  { %1142 = vmatmul.msk.bf16.vlgmr.msrb.gmra.mxu1 %vm517_vm2, %v838_v61  ;;  %v1916_v61 = vld [vmem:[%s1996_s13] ss:$0 sm:$0xff]  ;;  %s991_s13 = sshll.u32 %s1574_s12, 4  ;;  %s992_s13 = int_to_ptr.vmem [resolvable:$true] %s991_s13 }
 0x4c5   :  { %v686_v1 = vmul.f32 %v685_v0, %v685_v0 }
 0x4c7   :  { %v687_v30 = vsel %vm188_vm0, %v686_v1, 0.0 }
 0x4c8   :  { %688 = vadd.xlane.f32.xlu2 %v687_v30  ;;  %v715_v2 = vpop.xlane.xlu2 %714 }
 0x4c9   :  { %v716_v25 = vmul.f32 %v715_v2, %v1875_v58 }
 0x4cb   :  { %v897_v52 = vpop.xlane.xlu1 %896  ;;  %v1887_v7 = vsub.f32 %v1862_v5, %v716_v25 }
 0x4cc   :  { %v898_v3 = vmul.f32 %v897_v52, %v1875_v58 }
 0x4cd   :  { %v718_v9 = vmul.f32 %v1887_v7, %v1887_v7 }
 0x4ce   :  { %v899_v4 = vsub.f32 %v1867_v14, %v898_v3 }
 0x4cf   :  { %v719_v11 = vsel %vm188_vm0, %v718_v9, 0.0 }
 0x4d0   :  { %v900_v6 = vmul.f32 %v899_v4, %v899_v4 }
 0x4d2   :  { %v901_v63 = vsel %vm188_vm0, %v900_v6, 0.0 }
 0x4d3   :  { %902 = vadd.xlane.f32.xlu2 %v901_v63 }
 0x4db   :  { %720 = vadd.xlane.f32.xlu2 %v719_v11 }
 0x4e3   :  { %v325_v10 = vpop.permute.xlu1 %324 }
 0x4e4   :  { %330 = vst.msk [vmem:[#allocation14] sm:$0xff] %vm188_vm0, %v325_v10 }
 0x4eb   :  { %v474_v16 = vpop.permute.xlu1 %473 }
 0x4ec   :  { %478 = vst.msk [vmem:[#allocation13 + $0x8] sm:$0xff] %vm188_vm0, %v474_v16 }
 0x53b   :  { %v689_v14 = vpop.xlane.xlu2 %688 }
 0x53c   :  { %v690_v19 = vmul.f32 %v689_v14, %v1875_v58 }
 0x53e   :  { %v691_v5 = vadd.f32 1e-05, %v690_v19 }
 0x540   :  { %1220 = vrsqrt.f32 %v691_v5  ;;  %vm698_vm11 = vweird.f32 %v691_v5 }
 0x541   :  { %v856_v20 = vpop.f32.mrf.mxu1 }
 0x542   :  { %v877_v13 = vpack.c.bf16 %v856_v20, %v856_v20 }
 0x544   :  { %1144 = vmatmul.msk.bf16.vlgmr.msrb.gmra.mxu3 %vm188_vm0, %v877_v13 }
 0x546   :  { %v1221_v22 = vpop.eup %1220  ;;  %v903_v24 = vpop.xlane.xlu2 %902 }
 0x547   :  { %v693_v27 = vmul.f32 %v1221_v22, %v691_v5  ;;  %v904_v17 = vmul.f32 %v903_v24, %v1875_v58  ;;  %vm699_vm2 = vweird.f32 %v1221_v22 }
 0x548   :  { %vm700_vm12 = vmor %vm698_vm11, %vm699_vm2 }
 0x549   :  { %v694_v28 = vmul.f32 %v1221_v22, %v693_v27  ;;  %v905_v34 = vadd.f32 1e-05, %v904_v17  ;;  %v858_v29 = vpop.f32.mrf.mxu1 }
 0x54b   :  { %v695_v26 = vmul.f32 0.5, %v694_v28  ;;  %1222 = vrsqrt.f32 %v905_v34  ;;  %vm912_vm14 = vweird.f32 %v905_v34 }
 0x54d   :  { %v696_v31 = vsub.f32 1.5, %v695_v26 }
 0x54e   :  { %v721_v12 = vpop.xlane.xlu2 %720 }
 0x54f   :  { %v697_v32 = vmul.f32 %v1221_v22, %v696_v31  ;;  %v722_v37 = vmul.f32 %v721_v12, %v1875_v58 }
 0x551   :  { %v1223_v35 = vpop.eup %1222  ;;  %v701_v38 = vsel %vm700_vm12, %v1221_v22, %v697_v32  ;;  %v723_v21 = vadd.f32 1e-05, %v722_v37 }
 0x552   :  { %v702_v39 = vmul.f32 %v701_v38, %v685_v0  ;;  %v907_v40 = vmul.f32 %v1223_v35, %v905_v34  ;;  %vm913_vm13 = vweird.f32 %v1223_v35 }
 0x553   :  { %1224 = vrsqrt.f32 %v723_v21  ;;  %vm914_vm15 = vmor %vm912_vm14, %vm913_vm13  ;;  %vm730_vm3 = vweird.f32 %v723_v21 }
 0x554   :  { %v706_v42 = vmul.f32 %v1180_v33, %v702_v39  ;;  %v908_v43 = vmul.f32 %v1223_v35, %v907_v40 }
 0x556   :  { %v909_v44 = vmul.f32 0.5, %v908_v43  ;;  %v710_v45 = vadd.f32 %v1182_v41, %v706_v42 }
 0x558   :  { %v910_v46 = vsub.f32 1.5, %v909_v44  ;;  %711 = vst.msk [vmem:[#allocation17] sm:$0xff] %vm188_vm0, %v710_v45 }
 0x559   :  { %v1225_v47 = vpop.eup %1224 }
 0x55a   :  { %v911_v48 = vmul.f32 %v1223_v35, %v910_v46  ;;  %v725_v23 = vmul.f32 %v1225_v47, %v723_v21  ;;  %vm731_vm1 = vweird.f32 %v1225_v47 }
 0x55b   :  { %vm732_vm4 = vmor %vm730_vm3, %vm731_vm1 }
 0x55c   :  { %v915_v49 = vsel %vm914_vm15, %v1223_v35, %v911_v48  ;;  %v726_v50 = vmul.f32 %v1225_v47, %v725_v23 }
 0x55d   :  { %v916_v51 = vmul.f32 %v915_v49, %v899_v4  ;;  %v1112_v4 = vmul.f32 -1.442695, %v1757_v36 }
 0x55e   :  { %v727_v18 = vmul.f32 0.5, %v726_v50 }
 0x55f   :  { %v917_v54 = vmul.f32 %v1180_v33, %v916_v51  ;;  %1226 = vpow2.f32 %v1112_v4 }
 0x560   :  { %v728_v53 = vsub.f32 1.5, %v727_v18 }
 0x561   :  { %v918_v56 = vadd.f32 %v1182_v41, %v917_v54 }
 0x562   :  { %v729_v59 = vmul.f32 %v1225_v47, %v728_v53 }
 0x563   :  { %920 = vst.msk [vmem:[#allocation17 + $0x8] sm:$0xff] %vm188_vm0, %v918_v56 }
 0x564   :  { %v733_v8 = vsel %vm732_vm4, %v1225_v47, %v729_v59  ;;  %999 = dma.vmem_to_hbm [thread:$0]  %s992_s13, 256, %s994_s3, [#allocation18], %s1561_s4, %s1561_s4, %s1562_s29  }
 0x565   :  { %v734_v60 = vmul.f32 %v733_v8, %v1887_v7  ;;  %v1227_v6 = vpop.eup %1226  ;;  %s2016_s13 = sld [smem:[#allocation36_spill]] }
 0x566   :  { %v291_v7 = vadd.f32 1.0, %v1227_v6 }
 0x567   :  { %v738_v0 = vmul.f32 %v1909_v55, %v734_v60 }
 0x568   :  { %1228 = vrcp.f32 %v291_v7  ;;  %v318_v5 = vand.u32 2147483648, %v291_v7  ;;  %vm312_vm6 = vweird.f32 %v291_v7  ;;  %v316_v20 = vand.u32 2147483647, %v291_v7 }
 0x569   :  { %v742_v1 = vadd.f32 %v1916_v61, %v738_v0 }
 0x56a   :  { %v319_v22 = vor.u32 1.1754944e-38, %v318_v5  ;;  %vm317_vm8 = vcmp.eq.f32.partialorder %v316_v20, 8.507059e+37 }
 0x56b   :  { %743 = vst.msk [vmem:[#allocation19] sm:$0xff] %vm188_vm0, %v742_v1  ;;  %s980_s23 = sshll.u32 %s2016_s13, 4  ;;  %s981_s23 = int_to_ptr.hbm [resolvable:$true] %s980_s23 }
 0x56e   :  { %v1229_v10 = vpop.eup %1228 }
 0x56f   :  { %v308_v16 = vmul.f32 %v1229_v10, %v291_v7  ;;  %vm313_vm5 = vweird.f32 %v1229_v10 }
 0x570   :  { %vm314_vm7 = vmor %vm312_vm6, %vm313_vm5 }
 0x5c7   :  { %v890_v30 = vpop.f32.mrf.mxu3 }
 0x5c8   :  { %v891_v2 = vadd.f32 %v1853_v62, %v890_v30 }
 0x5ca   :  { %v921_v52 = vadd.f32 %v891_v2, %v1726_v15 }
 0x5cc   :  { %v922_v3 = vsel %vm188_vm0, %v921_v52, 0.0 }
 0x5cd   :  { %923 = vadd.xlane.f32.xlu0 %v922_v3 }
 0x5cf   :  { %v892_v25 = vpop.f32.mrf.mxu3 }
 0x5e1   :  { %471 = vrot.lane.b32.xlu0 %v1820_v57, %s1570_s30  ;;  %v309_v57 = vsub.f32 1.0, %v308_v16  ;;  %s952_s30 = sshll.u32 %s1576_s17, 4  ;;  %s953_s30 = int_to_ptr.vmem [resolvable:$true] %s952_s30 }
 0x5e3   :  { %v310_v36 = vmul.f32 %v1229_v10, %v309_v57 }
 0x5e5   :  { %v311_v19 = vadd.f32 %v1229_v10, %v310_v36 }
 0x5e7   :  { %v315_v13 = vsel %vm314_vm7, %v1229_v10, %v311_v19 }
 0x5e8   :  { %v320_v24 = vsel %vm317_vm8, %v319_v22, %v315_v13 }
 0x640   :  { %v924_v63 = vpop.xlane.xlu0 %923 }
 0x641   :  { %v925_v9 = vmul.f32 %v924_v63, %v1875_v58 }
 0x643   :  { %v1928_v11 = vsub.f32 %v921_v52, %v925_v9 }
 0x645   :  { %v927_v15 = vmul.f32 %v1928_v11, %v1928_v11 }
 0x647   :  { %v928_v62 = vsel %vm188_vm0, %v927_v15, 0.0 }
 0x648   :  { %929 = vadd.xlane.f32.xlu2 %v928_v62 }
 0x653   :  { %v472_v14 = vpop.permute.xlu0 %471 }
 0x654   :  { %477 = vst.msk [vmem:[#allocation13] sm:$0xff] %vm188_vm0, %v472_v14 }
 0x655   :  { %960 = dma.vmem_to_hbm [thread:$0]  %s953_s30, 256, %s955_s1, [#allocation4], %s1561_s4, %s1561_s4, %s1562_s29  }
 0x660   :  { %326 = vrot.lane.b32.xlu2 %v320_v24, %s1572_s7  ;;  %s965_s7 = sshll.u32 %s1578_s14, 4  ;;  %s966_s7 = int_to_ptr.vmem [resolvable:$true] %s965_s7 }
 0x6bb   :  { %v930_v27 = vpop.xlane.xlu2 %929 }
 0x6bc   :  { %v931_v17 = vmul.f32 %v930_v27, %v1875_v58 }
 0x6be   :  { %v932_v28 = vadd.f32 1e-05, %v931_v17 }
 0x6c0   :  { %1230 = vrsqrt.f32 %v932_v28  ;;  %vm939_vm10 = vweird.f32 %v932_v28 }
 0x6c3   :  { %v327_v34 = vpop.permute.xlu2 %326 }
 0x6c4   :  { %331 = vst.msk [vmem:[#allocation14 + $0x8] sm:$0xff] %vm188_vm0, %v327_v34 }
 0x6c5   :  { %973 = dma.vmem_to_hbm [thread:$0]  %s966_s7, 256, %s968_s11, [#allocation15], %s1561_s4, %s1561_s4, %s1562_s29  }
 0x6c6   :  { %v1231_v58 = vpop.eup %1230  ;;  %986 = dma.vmem_to_hbm [thread:$0]  %s979_s2, 256, %s981_s23, [#allocation15], %s1561_s4, %s1561_s4, %s1562_s29  }
 0x6c7   :  { %v934_v29 = vmul.f32 %v1231_v58, %v932_v28  ;;  %vm940_vm9 = vweird.f32 %v1231_v58 }
 0x6c8   :  { %vm941_vm2 = vmor %vm939_vm10, %vm940_vm9 }
 0x6c9   :  { %v935_v26 = vmul.f32 %v1231_v58, %v934_v29 }
 0x6cb   :  { %v936_v31 = vmul.f32 0.5, %v935_v26 }
 0x6cd   :  { %v937_v12 = vsub.f32 1.5, %v936_v31 }
 0x6cf   :  { %v938_v32 = vmul.f32 %v1231_v58, %v937_v12 }
 0x6d1   :  { %v942_v37 = vsel %vm941_vm2, %v1231_v58, %v938_v32 }
 0x6d2   :  { %v943_v33 = vmul.f32 %v942_v37, %v1928_v11 }
 0x6d4   :  { %v944_v35 = vmul.f32 %v1909_v55, %v943_v33 }
 0x6d6   :  { %v945_v38 = vadd.f32 %v1916_v61, %v944_v35 }
 0x6d8   :  { %947 = vst.msk [vmem:[#allocation19 + $0x8] sm:$0xff] %vm188_vm0, %v945_v38 }
 0x6d9   :  { %1012 = dma.vmem_to_hbm [thread:$0]  %s1005_s6, 256, %s1007_s27, [#allocation18], %s1561_s4, %s1561_s4, %s1562_s29  }
 0x6da   :  { %1552 = dma.done.wait [#allocation4], 256  }
 0x6db   :  { %1553 = vsyncadd [#allocation4], 4294967040 }
 0x6dc   :  { %1554 = dma.done.wait [#allocation15], 512  }
 0x6dd   :  { %1555 = vsyncadd [#allocation15], 4294966784 }
 0x6de   :  { %1556 = dma.done.wait [#allocation18], 512  }
 0x6df   :  { %1557 = vsyncadd [#allocation18], 4294966784 }
 0x6e0   :  { %1558 = dma.done.wait [#allocation21], 512  }
 0x6e1   :  { %1559 = vsyncadd [#allocation21], 4294966784 }
 0x6e2   :  { %1067 = vsyncpa [#allocation3], 1 }
 0x6e3   :  { %1068 = vsyncpa [#allocation6], 1 }
 0x6e4   :  { %1069 = vsyncpa [#allocation9], 1 }
 0x6e5   :  { %1070 = vsyncpa [#allocation12], 1 }
 0x6e6   :  { %1071 = vsyncpa [#allocation4], 1 }
 0x6e7   :  { %1072 = vsyncpa [#allocation15], 1 }
 0x6e8   :  { %1073 = vsyncpa [#allocation18], 1 }
 0x6e9   :  { %1074 = vsyncpa [#allocation21], 1 }

</bundles_post_ra>
